<compile_context>
chip_gen: v5e
topology: v5e:2x2
jax: 0.10.0
libtpu: 0.0.40
codegen_flags: <defaults>
</compile_context>

<pallas_src>
import math

import jax
import jax.numpy as jnp
import numpy as np
from jax.experimental import pallas as pl
from jax.experimental.pallas import tpu as pltpu


# ----------------------------------------------------------------------------
# Pallas kernel
# ----------------------------------------------------------------------------
def _make_self_block_kernel(num_heads: int, head_dim: int):
    D = num_heads * head_dim
    scale = 1.0 / math.sqrt(head_dim)
    inv_sqrt2 = 1.0 / math.sqrt(2.0)

    def kernel(
        x_ref, cos_ref, sine_ref, sino_ref,
        wqkv_ref, bqkv_ref,
        wout_ref, bout_ref,
        w1x_ref, w1m_ref, b1_ref, lnw_ref, lnb_ref, w2_ref, b2_ref,
        o_ref,
    ):
        x = x_ref[...]                                   # (N, D) f32
        xb = x.astype(jnp.bfloat16)                      # bf16 only at MXU inputs
        cos = cos_ref[...]                               # (N, D) f32
        sin_e = sine_ref[...]                            # -sin on even lanes, 0 on odd
        sin_o = sino_ref[...]                            # +sin on odd lanes, 0 on even

        # --- fused QKV projection: one MXU pass, f32 accumulation --------------
        qkv = jnp.dot(xb, wqkv_ref[...],
                      preferred_element_type=jnp.float32) + bqkv_ref[...]   # (N, 3D)
        q = qkv[:, 0:D]                                  # 128-lane aligned slices
        k = qkv[:, D:2 * D]
        v = qkv[:, 2 * D:3 * D]

        # --- rotary embedding (adjacent-pair rotate_half) ----------------------
        # rope(t)[j] = t[j]*cos[j] - t[j+1]*sin[j] (j even) / + t[j-1]*sin[j] (j odd)
        def rope(t):
            return (t * cos
                    + pltpu.roll(t, shift=D - 1, axis=1) * sin_e   # t[:, j+1]
                    + pltpu.roll(t, shift=1, axis=1) * sin_o)      # t[:, j-1]

        q = rope(q)
        k = rope(k)

        qb = q.astype(jnp.bfloat16)
        kb = k.astype(jnp.bfloat16)
        vb = v.astype(jnp.bfloat16)

        # --- per-head scaled-dot-product attention (heads unrolled) ------------
        dn = (((1,), (1,)), ((), ()))        # contract dim 1 of q with dim 1 of k
        ctx_heads = []
        for h in range(num_heads):
            sl = slice(h * head_dim, (h + 1) * head_dim)
            s = jax.lax.dot_general(qb[:, sl], kb[:, sl], dn,
                                    preferred_element_type=jnp.float32) * scale  # (N, N)
            s_max = jnp.max(s, axis=-1, keepdims=True)
            p = jnp.exp(s - s_max)                                   # f32 EUP
            p = p * pl.reciprocal(jnp.sum(p, axis=-1, keepdims=True), approx=True)
            ctx_heads.append(jnp.dot(p.astype(jnp.bfloat16), vb[:, sl],
                                     preferred_element_type=jnp.float32))
        context = jnp.concatenate(ctx_heads, axis=1)                 # (N, D)

        message = jnp.dot(context.astype(jnp.bfloat16), wout_ref[...],
                          preferred_element_type=jnp.float32) + bout_ref[...]

        # --- FFN1 without the (N, 2D) concat ------------------------------------
        h1 = (jnp.dot(xb, w1x_ref[...], preferred_element_type=jnp.float32)
              + jnp.dot(message.astype(jnp.bfloat16), w1m_ref[...],
                        preferred_element_type=jnp.float32)
              + b1_ref[...])                                         # (N, 2D) f32

        # --- LayerNorm (one-pass stats) + exact GELU ----------------------------
        mu = jnp.mean(h1, axis=-1, keepdims=True)
        ms = jnp.mean(h1 * h1, axis=-1, keepdims=True)
        var = ms - mu * mu
        hn = (h1 - mu) * jax.lax.rsqrt(var + 1e-5) * lnw_ref[...] + lnb_ref[...]
        g = 0.5 * hn * (1.0 + jax.lax.erf(hn * inv_sqrt2))           # exact GELU

        # --- FFN2 + residual ----------------------------------------------------
        out = x + jnp.dot(g.astype(jnp.bfloat16), w2_ref[...],
                          preferred_element_type=jnp.float32) + b2_ref[...]
        o_ref[...] = out

    return kernel


# ----------------------------------------------------------------------------
# One-time parameter / rotary-table preparation (hoisted out of the forward)
# ----------------------------------------------------------------------------
def prepare_self_block_params(params, *, num_heads: int):
    D = params["out_w"].shape[0]
    hd = D // num_heads

    # Un-interleave PyTorch Wqkv (out col c = h*hd*3 + d*3 + s) into one fused
    # (D_in, 3D_out) weight with column order  q(h,d) | k(h,d) | v(h,d).
    Wqkv, bqkv = params["Wqkv_w"], params["Wqkv_b"]       # (3D, D), (3D,)
    Wr = Wqkv.reshape(num_heads, hd, 3, D)
    br = bqkv.reshape(num_heads, hd, 3)
    wqkv = jnp.concatenate(
        [Wr[:, :, 0, :].reshape(D, D),
         Wr[:, :, 1, :].reshape(D, D),
         Wr[:, :, 2, :].reshape(D, D)], axis=0).T.astype(jnp.bfloat16)   # (D, 3D)
    bqkv_f = jnp.concatenate(
        [br[:, :, 0].reshape(D), br[:, :, 1].reshape(D),
         br[:, :, 2].reshape(D)]).reshape(1, 3 * D).astype(jnp.float32)

    wout = params["out_w"].T.astype(jnp.bfloat16)          # (D, D)
    bout = params["out_b"].reshape(1, D).astype(jnp.float32)

    # Split FFN1 so the kernel avoids the (N, 2D) activation concat.
    w1t = params["ffn1_w"].T                               # (2D_in, 2D_out)
    w1x = w1t[:D, :].astype(jnp.bfloat16)                  # acts on x
    w1m = w1t[D:, :].astype(jnp.bfloat16)                  # acts on message
    b1 = params["ffn1_b"].reshape(1, 2 * D).astype(jnp.float32)
    lnw = params["ln_w"].reshape(1, 2 * D).astype(jnp.float32)
    lnb = params["ln_b"].reshape(1, 2 * D).astype(jnp.float32)
    w2 = params["ffn2_w"].T.astype(jnp.bfloat16)           # (2D, D)
    b2 = params["ffn2_b"].reshape(1, D).astype(jnp.float32)

    return (wqkv, bqkv_f, wout, bout, w1x, w1m, b1, lnw, lnb, w2, b2)


def prepare_rotary_tables(encoding, *, num_heads: int):
    """encoding: (2, 1, 1, N, head_dim) cached cos/sin tables (broadcast over heads)."""
    _, _, _, N, hd = encoding.shape
    D = num_heads * hd
    cos = jnp.tile(encoding[0].reshape(N, hd), (1, num_heads)).astype(jnp.float32)
    sin = jnp.tile(encoding[1].reshape(N, hd), (1, num_heads)).astype(jnp.float32)
    even = (jnp.arange(D) % 2 == 0)[None, :]
    sin_even = jnp.where(even, -sin, 0.0)   # multiplies roll(t, -1) = t[:, j+1]
    sin_odd = jnp.where(even, 0.0, sin)     # multiplies roll(t, +1) = t[:, j-1]
    return (cos, sin_even, sin_odd)


# ----------------------------------------------------------------------------
# Forward: thin wrapper around pallas_call (no per-call re-layout)
# ----------------------------------------------------------------------------
def self_block_forward(x, rotary, wparams, *, num_heads: int):
    """x: (1, N, D); rotary/wparams from the prepare_* helpers."""
    assert x.shape[0] == 1
    N, D = x.shape[1], x.shape[2]
    head_dim = D // num_heads

    kernel = _make_self_block_kernel(num_heads, head_dim)
    inputs = (x[0],) + tuple(rotary) + tuple(wparams)
    vmem = pl.BlockSpec(memory_space=pltpu.MemorySpace.VMEM)
    out = pl.pallas_call(
        kernel,
        out_shape=jax.ShapeDtypeStruct((N, D), jnp.float32),
        in_specs=[vmem] * len(inputs),
        out_specs=vmem,
    )(*inputs)
    return out[None]                                      # (1, N, D)


# ----------------------------------------------------------------------------
# Pure-JAX f32 reference mirroring the PyTorch module op-for-op
# ----------------------------------------------------------------------------
def self_block_reference(x, encoding, params, *, num_heads: int):
    N, D = x.shape[1], x.shape[2]
    hd = D // num_heads
    x2d = x[0]
    qkv = x2d @ params["Wqkv_w"].T + params["Wqkv_b"]                 # (N, 3D)
    qkv = qkv.reshape(N, num_heads, hd, 3).transpose(1, 0, 2, 3)      # (H, N, hd, 3)
    q, k, v = qkv[..., 0], qkv[..., 1], qkv[..., 2]

    def rot_half(t):
        t2 = t.reshape(num_heads, N, hd // 2, 2)
        return jnp.stack([-t2[..., 1], t2[..., 0]], axis=-1).reshape(num_heads, N, hd)

    cos = encoding[0].reshape(1, N, hd)
    sin = encoding[1].reshape(1, N, hd)
    q = q * cos + rot_half(q) * sin
    k = k * cos + rot_half(k) * sin

    s = jnp.einsum("hnd,hmd->hnm", q, k) / math.sqrt(hd)
    p = jax.nn.softmax(s, axis=-1)
    ctx = jnp.einsum("hnm,hmd->hnd", p, v)
    ctx = ctx.transpose(1, 0, 2).reshape(N, D)

    msg = ctx @ params["out_w"].T + params["out_b"]
    cat = jnp.concatenate([x2d, msg], axis=-1)
    h1 = cat @ params["ffn1_w"].T + params["ffn1_b"]
    mu = h1.mean(-1, keepdims=True)
    var = ((h1 - mu) ** 2).mean(-1, keepdims=True)
    hn = (h1 - mu) / jnp.sqrt(var + 1e-5) * params["ln_w"] + params["ln_b"]
    g = jax.nn.gelu(hn, approximate=False)
    return (x2d + g @ params["ffn2_w"].T + params["ffn2_b"])[None]


# ----------------------------------------------------------------------------
if __name__ == "__main__":
    embed_dim = 128
    num_heads = 2
    head_dim = embed_dim // num_heads   # 64, matching MHAHeadDim64
    N = 16                              # sequence length, batch = 1

    key = jax.random.PRNGKey(0)
    keys = jax.random.split(key, 16)

    def init(k, shape, scale=0.05):
        return scale * jax.random.normal(k, shape, dtype=jnp.float32)

    params = {
        "Wqkv_w": init(keys[0], (3 * embed_dim, embed_dim)),
        "Wqkv_b": init(keys[1], (3 * embed_dim,)),
        "out_w": init(keys[2], (embed_dim, embed_dim)),
        "out_b": init(keys[3], (embed_dim,)),
        "ffn1_w": init(keys[4], (2 * embed_dim, 2 * embed_dim)),
        "ffn1_b": init(keys[5], (2 * embed_dim,)),
        "ln_w": jnp.ones((2 * embed_dim,), jnp.float32),
        "ln_b": jnp.zeros((2 * embed_dim,), jnp.float32),
        "ffn2_w": init(keys[6], (embed_dim, 2 * embed_dim)),
        "ffn2_b": init(keys[7], (embed_dim,)),
    }

    x = jax.random.normal(keys[8], (1, N, embed_dim), dtype=jnp.float32)
    # rotary encoding: (2, B=1, 1, N, head_dim) = stacked cos / sin tables
    angles = jax.random.uniform(keys[9], (1, 1, N, head_dim), dtype=jnp.float32) * (2 * math.pi)
    encoding = jnp.stack([jnp.cos(angles), jnp.sin(angles)], axis=0)

    # --- one-time prep (model load), then the hot forward path ---------------
    wparams = prepare_self_block_params(params, num_heads=num_heads)
    rotary = prepare_rotary_tables(encoding, num_heads=num_heads)

    out = self_block_forward(x, rotary, wparams, num_heads=num_heads)
    out = jax.block_until_ready(out)

    ref = self_block_reference(x, encoding, params, num_heads=num_heads)
    # bf16 matmul inputs (per perf review) vs. the all-f32 reference: tolerance
    # widened accordingly; vector math (softmax/LN/GELU) stays f32 in-kernel.
    np.testing.assert_allclose(np.asarray(out), np.asarray(ref), atol=2e-2, rtol=2e-2)

    print("KERNEL_OK")
</pallas_src>

<mosaic_0001>
module attributes {stable_mosaic.version = 11 : i64} {
  func.func @kernel(%arg0: memref<16x128xf32, #tpu.memory_space<vmem>>, %arg1: memref<16x128xf32, #tpu.memory_space<vmem>>, %arg2: memref<16x128xf32, #tpu.memory_space<vmem>>, %arg3: memref<16x128xf32, #tpu.memory_space<vmem>>, %arg4: memref<128x384xbf16, #tpu.memory_space<vmem>>, %arg5: memref<1x384xf32, #tpu.memory_space<vmem>>, %arg6: memref<128x128xbf16, #tpu.memory_space<vmem>>, %arg7: memref<1x128xf32, #tpu.memory_space<vmem>>, %arg8: memref<128x256xbf16, #tpu.memory_space<vmem>>, %arg9: memref<128x256xbf16, #tpu.memory_space<vmem>>, %arg10: memref<1x256xf32, #tpu.memory_space<vmem>>, %arg11: memref<1x256xf32, #tpu.memory_space<vmem>>, %arg12: memref<1x256xf32, #tpu.memory_space<vmem>>, %arg13: memref<256x128xbf16, #tpu.memory_space<vmem>>, %arg14: memref<1x128xf32, #tpu.memory_space<vmem>>, %arg15: memref<16x128xf32, #tpu.memory_space<vmem>>) attributes {dimension_semantics = [], scalar_prefetch = 0 : i64, scratch_operands = 0 : i64, tpu.core_type = #tpu.core_type<tc>} {
    %c0 = arith.constant 0 : index
    %c0_0 = arith.constant 0 : index
    %0 = vector.load %arg0[%c0, %c0_0] : memref<16x128xf32, #tpu.memory_space<vmem>>, vector<16x128xf32>
    %1 = arith.truncf %0 : vector<16x128xf32> to vector<16x128xbf16>
    %c0_1 = arith.constant 0 : index
    %c0_2 = arith.constant 0 : index
    %2 = vector.load %arg1[%c0_1, %c0_2] : memref<16x128xf32, #tpu.memory_space<vmem>>, vector<16x128xf32>
    %c0_3 = arith.constant 0 : index
    %c0_4 = arith.constant 0 : index
    %3 = vector.load %arg2[%c0_3, %c0_4] : memref<16x128xf32, #tpu.memory_space<vmem>>, vector<16x128xf32>
    %c0_5 = arith.constant 0 : index
    %c0_6 = arith.constant 0 : index
    %4 = vector.load %arg3[%c0_5, %c0_6] : memref<16x128xf32, #tpu.memory_space<vmem>>, vector<16x128xf32>
    %c0_7 = arith.constant 0 : index
    %c0_8 = arith.constant 0 : index
    %5 = vector.load %arg4[%c0_7, %c0_8] : memref<128x384xbf16, #tpu.memory_space<vmem>>, vector<128x384xbf16>
    %cst = arith.constant dense<0.000000e+00> : vector<16x384xf32>
    %6 = tpu.matmul %1, %5, %cst {dimension_numbers = #tpu.dot_dimension_numbers<[1], [0], [0], [1], [0, 0, 1, 1], [], []>} : vector<16x128xbf16>, vector<128x384xbf16>, vector<16x384xf32> -> vector<16x384xf32>
    %c0_9 = arith.constant 0 : index
    %c0_10 = arith.constant 0 : index
    %7 = vector.load %arg5[%c0_9, %c0_10] : memref<1x384xf32, #tpu.memory_space<vmem>>, vector<1x384xf32>
    %8 = vector.broadcast %7 : vector<1x384xf32> to vector<16x384xf32>
    %9 = arith.addf %6, %8 : vector<16x384xf32>
    %10 = vector.extract_strided_slice %9 {offsets = [0, 0], sizes = [16, 128], strides = [1, 1]} : vector<16x384xf32> to vector<16x128xf32>
    %11 = vector.extract_strided_slice %9 {offsets = [0, 128], sizes = [16, 128], strides = [1, 1]} : vector<16x384xf32> to vector<16x128xf32>
    %12 = vector.extract_strided_slice %9 {offsets = [0, 256], sizes = [16, 128], strides = [1, 1]} : vector<16x384xf32> to vector<16x128xf32>
    %13 = arith.mulf %10, %2 : vector<16x128xf32>
    %c127_i32 = arith.constant 127 : i32
    %14 = tpu.dynamic_rotate %10 by %c127_i32 dim 1 : vector<16x128xf32>, i32 -> vector<16x128xf32>
    %15 = arith.mulf %14, %3 : vector<16x128xf32>
    %16 = arith.addf %13, %15 : vector<16x128xf32>
    %c1_i32 = arith.constant 1 : i32
    %17 = tpu.dynamic_rotate %10 by %c1_i32 dim 1 : vector<16x128xf32>, i32 -> vector<16x128xf32>
    %18 = arith.mulf %17, %4 : vector<16x128xf32>
    %19 = arith.addf %16, %18 : vector<16x128xf32>
    %20 = arith.mulf %11, %2 : vector<16x128xf32>
    %c127_i32_11 = arith.constant 127 : i32
    %21 = tpu.dynamic_rotate %11 by %c127_i32_11 dim 1 : vector<16x128xf32>, i32 -> vector<16x128xf32>
    %22 = arith.mulf %21, %3 : vector<16x128xf32>
    %23 = arith.addf %20, %22 : vector<16x128xf32>
    %c1_i32_12 = arith.constant 1 : i32
    %24 = tpu.dynamic_rotate %11 by %c1_i32_12 dim 1 : vector<16x128xf32>, i32 -> vector<16x128xf32>
    %25 = arith.mulf %24, %4 : vector<16x128xf32>
    %26 = arith.addf %23, %25 : vector<16x128xf32>
    %27 = arith.truncf %19 : vector<16x128xf32> to vector<16x128xbf16>
    %28 = arith.truncf %26 : vector<16x128xf32> to vector<16x128xbf16>
    %29 = arith.truncf %12 : vector<16x128xf32> to vector<16x128xbf16>
    %30 = vector.extract_strided_slice %27 {offsets = [0, 0], sizes = [16, 64], strides = [1, 1]} : vector<16x128xbf16> to vector<16x64xbf16>
    %31 = vector.extract_strided_slice %28 {offsets = [0, 0], sizes = [16, 64], strides = [1, 1]} : vector<16x128xbf16> to vector<16x64xbf16>
    %cst_13 = arith.constant dense<0.000000e+00> : vector<16x16xf32>
    %32 = tpu.matmul %30, %31, %cst_13 {dimension_numbers = #tpu.dot_dimension_numbers<[1], [1], [0], [0], [0, 0, 1, 0], [], []>} : vector<16x64xbf16>, vector<16x64xbf16>, vector<16x16xf32> -> vector<16x16xf32>
    %cst_14 = arith.constant 1.250000e-01 : f32
    %33 = vector.broadcast %cst_14 : f32 to vector<16x16xf32>
    %34 = arith.mulf %32, %33 : vector<16x16xf32>
    %cst_15 = arith.constant dense<0xFF800000> : vector<16xf32>
    %35 = vector.multi_reduction <maximumf>, %34, %cst_15 [1] : vector<16x16xf32> to vector<16xf32>
    %36 = vector.shape_cast %35 : vector<16xf32> to vector<16x1xf32>
    %37 = vector.broadcast %36 : vector<16x1xf32> to vector<16x16xf32>
    %38 = arith.subf %34, %37 : vector<16x16xf32>
    %39 = math.exp %38 : vector<16x16xf32>
    %cst_16 = arith.constant dense<0.000000e+00> : vector<16xf32>
    %40 = vector.multi_reduction <add>, %39, %cst_16 [1] : vector<16x16xf32> to vector<16xf32>
    %41 = vector.shape_cast %40 : vector<16xf32> to vector<16x1xf32>
    %42 = tpu.reciprocal %41 {approx = true} : vector<16x1xf32> -> vector<16x1xf32>
    %43 = vector.broadcast %42 : vector<16x1xf32> to vector<16x16xf32>
    %44 = arith.mulf %39, %43 : vector<16x16xf32>
    %45 = arith.truncf %44 : vector<16x16xf32> to vector<16x16xbf16>
    %46 = vector.extract_strided_slice %29 {offsets = [0, 0], sizes = [16, 64], strides = [1, 1]} : vector<16x128xbf16> to vector<16x64xbf16>
    %cst_17 = arith.constant dense<0.000000e+00> : vector<16x64xf32>
    %47 = tpu.matmul %45, %46, %cst_17 {dimension_numbers = #tpu.dot_dimension_numbers<[1], [0], [0], [1], [0, 0, 1, 1], [], []>} : vector<16x16xbf16>, vector<16x64xbf16>, vector<16x64xf32> -> vector<16x64xf32>
    %48 = vector.extract_strided_slice %27 {offsets = [0, 64], sizes = [16, 64], strides = [1, 1]} : vector<16x128xbf16> to vector<16x64xbf16>
    %49 = vector.extract_strided_slice %28 {offsets = [0, 64], sizes = [16, 64], strides = [1, 1]} : vector<16x128xbf16> to vector<16x64xbf16>
    %cst_18 = arith.constant dense<0.000000e+00> : vector<16x16xf32>
    %50 = tpu.matmul %48, %49, %cst_18 {dimension_numbers = #tpu.dot_dimension_numbers<[1], [1], [0], [0], [0, 0, 1, 0], [], []>} : vector<16x64xbf16>, vector<16x64xbf16>, vector<16x16xf32> -> vector<16x16xf32>
    %cst_19 = arith.constant 1.250000e-01 : f32
    %51 = vector.broadcast %cst_19 : f32 to vector<16x16xf32>
    %52 = arith.mulf %50, %51 : vector<16x16xf32>
    %cst_20 = arith.constant dense<0xFF800000> : vector<16xf32>
    %53 = vector.multi_reduction <maximumf>, %52, %cst_20 [1] : vector<16x16xf32> to vector<16xf32>
    %54 = vector.shape_cast %53 : vector<16xf32> to vector<16x1xf32>
    %55 = vector.broadcast %54 : vector<16x1xf32> to vector<16x16xf32>
    %56 = arith.subf %52, %55 : vector<16x16xf32>
    %57 = math.exp %56 : vector<16x16xf32>
    %cst_21 = arith.constant dense<0.000000e+00> : vector<16xf32>
    %58 = vector.multi_reduction <add>, %57, %cst_21 [1] : vector<16x16xf32> to vector<16xf32>
    %59 = vector.shape_cast %58 : vector<16xf32> to vector<16x1xf32>
    %60 = tpu.reciprocal %59 {approx = true} : vector<16x1xf32> -> vector<16x1xf32>
    %61 = vector.broadcast %60 : vector<16x1xf32> to vector<16x16xf32>
    %62 = arith.mulf %57, %61 : vector<16x16xf32>
    %63 = arith.truncf %62 : vector<16x16xf32> to vector<16x16xbf16>
    %64 = vector.extract_strided_slice %29 {offsets = [0, 64], sizes = [16, 64], strides = [1, 1]} : vector<16x128xbf16> to vector<16x64xbf16>
    %cst_22 = arith.constant dense<0.000000e+00> : vector<16x64xf32>
    %65 = tpu.matmul %63, %64, %cst_22 {dimension_numbers = #tpu.dot_dimension_numbers<[1], [0], [0], [1], [0, 0, 1, 1], [], []>} : vector<16x16xbf16>, vector<16x64xbf16>, vector<16x64xf32> -> vector<16x64xf32>
    %66 = tpu.concatenate %47, %65 in 1 : vector<16x64xf32>, vector<16x64xf32> -> vector<16x128xf32>
    %67 = arith.truncf %66 : vector<16x128xf32> to vector<16x128xbf16>
    %c0_23 = arith.constant 0 : index
    %c0_24 = arith.constant 0 : index
    %68 = vector.load %arg6[%c0_23, %c0_24] : memref<128x128xbf16, #tpu.memory_space<vmem>>, vector<128x128xbf16>
    %cst_25 = arith.constant dense<0.000000e+00> : vector<16x128xf32>
    %69 = tpu.matmul %67, %68, %cst_25 {dimension_numbers = #tpu.dot_dimension_numbers<[1], [0], [0], [1], [0, 0, 1, 1], [], []>} : vector<16x128xbf16>, vector<128x128xbf16>, vector<16x128xf32> -> vector<16x128xf32>
    %c0_26 = arith.constant 0 : index
    %c0_27 = arith.constant 0 : index
    %70 = vector.load %arg7[%c0_26, %c0_27] : memref<1x128xf32, #tpu.memory_space<vmem>>, vector<1x128xf32>
    %71 = vector.broadcast %70 : vector<1x128xf32> to vector<16x128xf32>
    %72 = arith.addf %69, %71 : vector<16x128xf32>
    %c0_28 = arith.constant 0 : index
    %c0_29 = arith.constant 0 : index
    %73 = vector.load %arg8[%c0_28, %c0_29] : memref<128x256xbf16, #tpu.memory_space<vmem>>, vector<128x256xbf16>
    %cst_30 = arith.constant dense<0.000000e+00> : vector<16x256xf32>
    %74 = tpu.matmul %1, %73, %cst_30 {dimension_numbers = #tpu.dot_dimension_numbers<[1], [0], [0], [1], [0, 0, 1, 1], [], []>} : vector<16x128xbf16>, vector<128x256xbf16>, vector<16x256xf32> -> vector<16x256xf32>
    %75 = arith.truncf %72 : vector<16x128xf32> to vector<16x128xbf16>
    %c0_31 = arith.constant 0 : index
    %c0_32 = arith.constant 0 : index
    %76 = vector.load %arg9[%c0_31, %c0_32] : memref<128x256xbf16, #tpu.memory_space<vmem>>, vector<128x256xbf16>
    %cst_33 = arith.constant dense<0.000000e+00> : vector<16x256xf32>
    %77 = tpu.matmul %75, %76, %cst_33 {dimension_numbers = #tpu.dot_dimension_numbers<[1], [0], [0], [1], [0, 0, 1, 1], [], []>} : vector<16x128xbf16>, vector<128x256xbf16>, vector<16x256xf32> -> vector<16x256xf32>
    %78 = arith.addf %74, %77 : vector<16x256xf32>
    %c0_34 = arith.constant 0 : index
    %c0_35 = arith.constant 0 : index
    %79 = vector.load %arg10[%c0_34, %c0_35] : memref<1x256xf32, #tpu.memory_space<vmem>>, vector<1x256xf32>
    %80 = vector.broadcast %79 : vector<1x256xf32> to vector<16x256xf32>
    %81 = arith.addf %78, %80 : vector<16x256xf32>
    %cst_36 = arith.constant dense<0.000000e+00> : vector<16xf32>
    %82 = vector.multi_reduction <add>, %81, %cst_36 [1] : vector<16x256xf32> to vector<16xf32>
    %83 = vector.shape_cast %82 : vector<16xf32> to vector<16x1xf32>
    %cst_37 = arith.constant 2.560000e+02 : f32
    %84 = vector.broadcast %cst_37 : f32 to vector<16x1xf32>
    %85 = arith.divf %83, %84 : vector<16x1xf32>
    %86 = arith.mulf %81, %81 : vector<16x256xf32>
    %cst_38 = arith.constant dense<0.000000e+00> : vector<16xf32>
    %87 = vector.multi_reduction <add>, %86, %cst_38 [1] : vector<16x256xf32> to vector<16xf32>
    %88 = vector.shape_cast %87 : vector<16xf32> to vector<16x1xf32>
    %cst_39 = arith.constant 2.560000e+02 : f32
    %89 = vector.broadcast %cst_39 : f32 to vector<16x1xf32>
    %90 = arith.divf %88, %89 : vector<16x1xf32>
    %91 = arith.mulf %85, %85 : vector<16x1xf32>
    %92 = arith.subf %90, %91 : vector<16x1xf32>
    %93 = vector.broadcast %85 : vector<16x1xf32> to vector<16x256xf32>
    %94 = arith.subf %81, %93 : vector<16x256xf32>
    %cst_40 = arith.constant 9.99999974E-6 : f32
    %95 = vector.broadcast %cst_40 : f32 to vector<16x1xf32>
    %96 = arith.addf %92, %95 : vector<16x1xf32>
    %97 = math.rsqrt %96 : vector<16x1xf32>
    %98 = vector.broadcast %97 : vector<16x1xf32> to vector<16x256xf32>
    %99 = arith.mulf %94, %98 : vector<16x256xf32>
    %c0_41 = arith.constant 0 : index
    %c0_42 = arith.constant 0 : index
    %100 = vector.load %arg11[%c0_41, %c0_42] : memref<1x256xf32, #tpu.memory_space<vmem>>, vector<1x256xf32>
    %101 = vector.broadcast %100 : vector<1x256xf32> to vector<16x256xf32>
    %102 = arith.mulf %99, %101 : vector<16x256xf32>
    %c0_43 = arith.constant 0 : index
    %c0_44 = arith.constant 0 : index
    %103 = vector.load %arg12[%c0_43, %c0_44] : memref<1x256xf32, #tpu.memory_space<vmem>>, vector<1x256xf32>
    %104 = vector.broadcast %103 : vector<1x256xf32> to vector<16x256xf32>
    %105 = arith.addf %102, %104 : vector<16x256xf32>
    %cst_45 = arith.constant 5.000000e-01 : f32
    %106 = vector.broadcast %cst_45 : f32 to vector<16x256xf32>
    %107 = arith.mulf %106, %105 : vector<16x256xf32>
    %cst_46 = arith.constant 0.707106769 : f32
    %108 = vector.broadcast %cst_46 : f32 to vector<16x256xf32>
    %109 = arith.mulf %105, %108 : vector<16x256xf32>
    %110 = math.erf %109 : vector<16x256xf32>
    %cst_47 = arith.constant 1.000000e+00 : f32
    %111 = vector.broadcast %cst_47 : f32 to vector<16x256xf32>
    %112 = arith.addf %111, %110 : vector<16x256xf32>
    %113 = arith.mulf %107, %112 : vector<16x256xf32>
    %114 = arith.truncf %113 : vector<16x256xf32> to vector<16x256xbf16>
    %c0_48 = arith.constant 0 : index
    %c0_49 = arith.constant 0 : index
    %115 = vector.load %arg13[%c0_48, %c0_49] : memref<256x128xbf16, #tpu.memory_space<vmem>>, vector<256x128xbf16>
    %cst_50 = arith.constant dense<0.000000e+00> : vector<16x128xf32>
    %116 = tpu.matmul %114, %115, %cst_50 {dimension_numbers = #tpu.dot_dimension_numbers<[1], [0], [0], [1], [0, 0, 1, 1], [], []>} : vector<16x256xbf16>, vector<256x128xbf16>, vector<16x128xf32> -> vector<16x128xf32>
    %117 = arith.addf %0, %116 : vector<16x128xf32>
    %c0_51 = arith.constant 0 : index
    %c0_52 = arith.constant 0 : index
    %118 = vector.load %arg14[%c0_51, %c0_52] : memref<1x128xf32, #tpu.memory_space<vmem>>, vector<1x128xf32>
    %119 = vector.broadcast %118 : vector<1x128xf32> to vector<16x128xf32>
    %120 = arith.addf %117, %119 : vector<16x128xf32>
    %c0_53 = arith.constant 0 : index
    %c0_54 = arith.constant 0 : index
    %121 = vector.load %arg15[%c0_53, %c0_54] : memref<16x128xf32, #tpu.memory_space<vmem>>, vector<16x128xf32>
    tpu.vector_store %arg15[%c0_53, %c0_54], %120 {strides = array<i32>} : memref<16x128xf32, #tpu.memory_space<vmem>>, vector<16x128xf32>,
    return
  }
}

</mosaic_0001>

<bundles_post_ra>
// kernel: tpu_custom_call.1
= control target key start
LH: loop header
LB: loop body
LE: loop exit
PB: predicated region body
PF: predicated region fallthrough
CT: control target
= control target key end

     0   :  { %20 = vsyncpa [#allocation3], 0  ;;  %s2506_s0 = inlined_call_operand.hbm [shape: f32[16,128], index: 0, kind: input, shape index: {}]   ;;  %s2507_s1 = inlined_call_operand.hbm [shape: f32[16,128], index: 1, kind: input, shape index: {}]   ;;  %s2508_s2 = inlined_call_operand.hbm [shape: f32[16,128], index: 2, kind: input, shape index: {}]   ;;  %s2509_s3 = inlined_call_operand.hbm [shape: f32[16,128], index: 3, kind: input, shape index: {}]   ;;  %s2510_s4 = inlined_call_operand.hbm [shape: bf16[128,384], index: 4, kind: input, shape index: {}]   ;;  %s2511_s5 = inlined_call_operand.vmem [shape: f32[1,384], index: 5, kind: input, shape index: {}]   ;;  %s2512_s6 = inlined_call_operand.hbm [shape: bf16[128,128], index: 6, kind: input, shape index: {}]   ;;  %s2513_s7 = inlined_call_operand.hbm [shape: f32[1,128], index: 7, kind: input, shape index: {}]   ;;  %s2514_s8 = inlined_call_operand.hbm [shape: bf16[128,256], index: 8, kind: input, shape index: {}]   ;;  %s2515_s9 = inlined_call_operand.hbm [shape: bf16[128,256], index: 9, kind: input, shape index: {}]   ;;  %s2516_s10 = inlined_call_operand.vmem [shape: f32[1,256], index: 10, kind: input, shape index: {}]   ;;  %s2517_s11 = inlined_call_operand.vmem [shape: f32[1,256], index: 11, kind: input, shape index: {}]   ;;  %s2518_s12 = inlined_call_operand.vmem [shape: f32[1,256], index: 12, kind: input, shape index: {}]   ;;  %s2519_s13 = inlined_call_operand.hbm [shape: bf16[256,128], index: 13, kind: input, shape index: {}]   ;;  %s2520_s14 = inlined_call_operand.vmem [shape: f32[1,128], index: 14, kind: input, shape index: {}]   ;;  %s2521_s15 = inlined_call_operand.hbm [shape: f32[16,128], index: 15, kind: output, shape index: {}]  }
   0x1   :  { %21 = vsyncpa [#allocation6], 0 }
   0x2   :  { %22 = vsyncpa [#allocation9], 0 }
   0x3   :  { %23 = vsyncpa [#allocation12], 0 }
   0x4   :  { %24 = vsyncpa [#allocation15], 0 }
   0x5   :  { %25 = vsyncpa [#allocation18], 0 }
   0x6   :  { %26 = vsyncpa [#allocation4], 0  ;;  %s44_s20 = sshll.u32 %s2507_s1, 4  ;;  %s2162_s21 = smov [#allocation5]   ;;  %s45_s20 = int_to_ptr.hbm [resolvable:$true] %s44_s20 }
   0x7   :  { %s46_s22 = sshll.u32 %s2162_s21, 4  ;;  %s70_s25 = sshll.u32 %s2509_s3, 4  ;;  %s47_s22 = int_to_ptr.vmem [resolvable:$true] %s46_s22  ;;  %s71_s25 = int_to_ptr.hbm [resolvable:$true] %s70_s25 }
   0x8   :  { %s2163_s26 = smov 128   ;;  %s2164_s27 = smov 8  }
   0x9   :  { %52 = dma.hbm_to_vmem [thread:$0]  %s45_s20, 256, %s47_s22, [#allocation6], %s2163_s26, %s2163_s26, %s2164_s27  }
   0xa   :  { %s2165_s28 = smov [#allocation8]   ;;  %s98_s1 = sshll.u32 %s2512_s6, 4  ;;  %s99_s1 = int_to_ptr.hbm [resolvable:$true] %s98_s1 }
   0xb   :  { %s72_s29 = sshll.u32 %s2165_s28, 4  ;;  %s2166_s3 = smov [#allocation11]   ;;  %s73_s29 = int_to_ptr.vmem [resolvable:$true] %s72_s29 }
   0xc   :  { %78 = dma.hbm_to_vmem [thread:$0]  %s71_s25, 256, %s73_s29, [#allocation9], %s2163_s26, %s2163_s26, %s2164_s27  }
   0xd   :  { %s100_s17 = sshll.u32 %s2166_s3, 4  ;;  %s122_s20 = sshll.u32 %s2514_s8, 4  ;;  %s101_s17 = int_to_ptr.vmem [resolvable:$true] %s100_s17  ;;  %s123_s20 = int_to_ptr.hbm [resolvable:$true] %s122_s20 }
   0xe   :  { %s2167_s21 = smov 64   ;;  %s2168_s22 = smov 4  }
   0xf   :  { %106 = dma.hbm_to_vmem [thread:$0]  %s99_s1, 1024, %s101_s17, [#allocation12], %s2167_s21, %s2167_s21, %s2168_s22  }
  0x10   :  { %s2169_s6 = smov [#allocation14]   ;;  %s31_s25 = sshll.u32 %s2506_s0, 4  ;;  %s32_s25 = int_to_ptr.hbm [resolvable:$true] %s31_s25 }
  0x11   :  { %s124_s23 = sshll.u32 %s2169_s6, 4  ;;  %s57_s30 = sshll.u32 %s2508_s2, 4  ;;  %s125_s23 = int_to_ptr.vmem [resolvable:$true] %s124_s23  ;;  %s58_s30 = int_to_ptr.hbm [resolvable:$true] %s57_s30 }
  0x12   :  { %130 = dma.hbm_to_vmem [thread:$0]  %s123_s20, 2048, %s125_s23, [#allocation15], %s2163_s26, %s2163_s26, %s2164_s27  }
  0x13   :  { %s2170_s16 = smov [#allocation2]   ;;  %s2171_s1 = smov [#allocation7]  }
  0x14   :  { %s33_s3 = sshll.u32 %s2170_s16, 4  ;;  %s59_s0 = sshll.u32 %s2171_s1, 4  ;;  %s34_s3 = int_to_ptr.vmem [resolvable:$true] %s33_s3  ;;  %s60_s0 = int_to_ptr.vmem [resolvable:$true] %s59_s0 }
  0x15   :  { %39 = dma.hbm_to_vmem [thread:$0]  %s32_s25, 256, %s34_s3, [#allocation3], %s2163_s26, %s2163_s26, %s2164_s27  }
  0x16   :  { %s83_s19 = sshll.u32 %s2510_s4, 4  ;;  %s2172_s2 = smov [#allocation10]   ;;  %s84_s19 = int_to_ptr.hbm [resolvable:$true] %s83_s19 }
  0x17   :  { %65 = dma.hbm_to_vmem [thread:$0]  %s58_s30, 256, %s60_s0, [#allocation6], %s2163_s26, %s2163_s26, %s2164_s27  }
  0x18   :  { %s85_s20 = sshll.u32 %s2172_s2, 4  ;;  %s112_s24 = sshll.u32 %s2513_s7, 4  ;;  %s86_s20 = int_to_ptr.vmem [resolvable:$true] %s85_s20  ;;  %s113_s24 = int_to_ptr.hbm [resolvable:$true] %s112_s24 }
  0x19   :  { %s2173_s28 = smov 192   ;;  %s2174_s25 = smov 12  }
  0x1a   :  { %91 = dma.hbm_to_vmem [thread:$0]  %s84_s19, 3072, %s86_s20, [#allocation9], %s2173_s28, %s2173_s28, %s2174_s25  }
  0x1b   :  { %s2175_s8 = smov [#allocation13]   ;;  %s135_s3 = sshll.u32 %s2515_s9, 4  ;;  %s136_s3 = int_to_ptr.hbm [resolvable:$true] %s135_s3 }
  0x1c   :  { %s114_s29 = sshll.u32 %s2175_s8, 4  ;;  %s154_s0 = sshll.u32 %s2519_s13, 4  ;;  %s115_s29 = int_to_ptr.vmem [resolvable:$true] %s114_s29  ;;  %s155_s0 = int_to_ptr.hbm [resolvable:$true] %s154_s0 }
  0x1d   :  { %117 = dma.hbm_to_vmem [thread:$0]  %s113_s24, 16, %s115_s29, [#allocation12]  }
  0x1e   :  { %s2176_s17 = smov [#allocation16]   ;;  %s2177_s7 = smov [#allocation17]  }
  0x1f   :  { %s137_s18 = sshll.u32 %s2176_s17, 4  ;;  %s156_s19 = sshll.u32 %s2177_s7, 4  ;;  %s138_s18 = int_to_ptr.vmem [resolvable:$true] %s137_s18  ;;  %s157_s19 = int_to_ptr.vmem [resolvable:$true] %s156_s19 }
  0x20   :  { %143 = dma.hbm_to_vmem [thread:$0]  %s136_s3, 2048, %s138_s18, [#allocation15], %s2163_s26, %s2163_s26, %s2164_s27  }
  0x21   :  { %162 = dma.hbm_to_vmem [thread:$0]  %s155_s0, 2048, %s157_s19, [#allocation18], %s2167_s21, %s2167_s21, %s2168_s22  }
  0x22   :  { %2148 = dma.done.wait [#allocation3], 256  }
  0x23   :  { %2149 = vsyncadd [#allocation3], 4294967040 }
  0x24   :  { %2150 = dma.done.wait [#allocation6], 512  }
  0x25   :  { %2151 = vsyncadd [#allocation6], 4294966784 }
  0x26   :  { %2152 = dma.done.wait [#allocation9], 3328  }
  0x27   :  { %2153 = vsyncadd [#allocation9], 4294963968 }
  0x28   :  { %2154 = dma.done.wait [#allocation12], 1040  }
  0x29   :  { %2155 = vsyncadd [#allocation12], 4294966256 }
  0x2a   :  { %2156 = dma.done.wait [#allocation15], 4096  }
  0x2b   :  { %2157 = vsyncadd [#allocation15], 4294963200 }
  0x2c   :  { %2158 = dma.done.wait [#allocation18], 2048  }
  0x2d   :  { %2159 = vsyncadd [#allocation18], 4294965248  ;;  %v1503_v0 = vld [vmem:[#allocation10 + $0xa8] sm:$0xf]  ;;  %v1767_v1 = vld [vmem:[#allocation10 + $0xb0] sm:$0xf0] }
  0x2e   :  { %v1766_v2 = vld [vmem:[#allocation10 + $0xac] sm:$0xf]  ;;  %v1504_v3 = vor.u32 %v1767_v1, %v1503_v0  ;;  %v1505_v4 = vld [vmem:[#allocation10 + $0xb4] sm:$0xf0]  ;;  %v1491_v5 = vld [vmem:[#allocation10 + $0x90] sm:$0xf] }
  0x2f   :  { %v1764_v6 = vld [vmem:[#allocation10 + $0x98] sm:$0xf0]  ;;  %v1508_v7 = vor.u32 %v1766_v2, %v1505_v4  ;;  %v1763_v8 = vld [vmem:[#allocation10 + $0x94] sm:$0xf]  ;;  %v1493_v9 = vld [vmem:[#allocation10 + $0x9c] sm:$0xf0] }
  0x30   :  { %383 = vmatpush.bf16.msra.mxu0 %v1504_v3  ;;  %v1492_v10 = vor.u32 %v1764_v6, %v1491_v5  ;;  %v1496_v11 = vor.u32 %v1763_v8, %v1493_v9  ;;  %v1479_v12 = vld [vmem:[#allocation10 + $0x78] sm:$0xf]  ;;  %v1761_v13 = vld [vmem:[#allocation10 + $0x80] sm:$0xf0]  ;;  %v1760_v14 = vld [vmem:[#allocation10 + $0x7c] sm:$0xf] }
  0x31   :  { %397 = vmatpush.bf16.msra.mxu1 %v1508_v7  ;;  %v1481_v15 = vld [vmem:[#allocation10 + $0x84] sm:$0xf0]  ;;  %v1480_v16 = vor.u32 %v1761_v13, %v1479_v12  ;;  %v1467_v18 = vld [vmem:[#allocation10 + $0x60] sm:$0xf]  ;;  %v1758_v19 = vld [vmem:[#allocation10 + $0x68] sm:$0xf0] }
  0x32   :  { %v1484_v17 = vor.u32 %v1760_v14, %v1481_v15  ;;  %v1757_v20 = vld [vmem:[#allocation10 + $0x64] sm:$0xf]  ;;  %v1469_v21 = vld [vmem:[#allocation10 + $0x6c] sm:$0xf0]  ;;  %v1468_v22 = vor.u32 %v1758_v19, %v1467_v18  ;;  %v1455_v24 = vld [vmem:[#allocation10 + $0x48] sm:$0xf] }
  0x33   :  { %v1472_v23 = vor.u32 %v1757_v20, %v1469_v21  ;;  %v1755_v25 = vld [vmem:[#allocation10 + $0x50] sm:$0xf0]  ;;  %v1754_v26 = vld [vmem:[#allocation10 + $0x4c] sm:$0xf]  ;;  %v1457_v27 = vld [vmem:[#allocation10 + $0x54] sm:$0xf0] }
  0x34   :  { %384 = vmatpush.bf16.msra.mxu0 %v1492_v10  ;;  %v1456_v28 = vor.u32 %v1755_v25, %v1455_v24  ;;  %v1460_v29 = vor.u32 %v1754_v26, %v1457_v27  ;;  %v1443_v30 = vld [vmem:[#allocation10 + $0x30] sm:$0xf]  ;;  %v1752_v31 = vld [vmem:[#allocation10 + $0x38] sm:$0xf0]  ;;  %v1751_v32 = vld [vmem:[#allocation10 + $0x34] sm:$0xf] }
  0x35   :  { %398 = vmatpush.bf16.msra.mxu1 %v1496_v11  ;;  %v1445_v33 = vld [vmem:[#allocation10 + $0x3c] sm:$0xf0]  ;;  %v1444_v34 = vor.u32 %v1752_v31, %v1443_v30  ;;  %v1431_v36 = vld [vmem:[#allocation10 + $0x18] sm:$0xf]  ;;  %v1749_v37 = vld [vmem:[#allocation10 + $0x20] sm:$0xf0] }
  0x36   :  { %v1448_v35 = vor.u32 %v1751_v32, %v1445_v33  ;;  %v1748_v38 = vld [vmem:[#allocation10 + $0x1c] sm:$0xf]  ;;  %v1433_v39 = vld [vmem:[#allocation10 + $0x24] sm:$0xf0]  ;;  %v1432_v40 = vor.u32 %v1749_v37, %v1431_v36  ;;  %v1419_v42 = vld [vmem:[#allocation10] sm:$0xf] }
  0x37   :  { %v1436_v41 = vor.u32 %v1748_v38, %v1433_v39  ;;  %v1746_v43 = vld [vmem:[#allocation10 + $0x8] sm:$0xf0]  ;;  %v1745_v44 = vld [vmem:[#allocation10 + $0x4] sm:$0xf]  ;;  %v1421_v45 = vld [vmem:[#allocation10 + $0xc] sm:$0xf0] }
  0x38   :  { %385 = vmatpush.bf16.msra.mxu0 %v1480_v16  ;;  %v1420_v46 = vor.u32 %v1746_v43, %v1419_v42  ;;  %v206_v47 = vld [vmem:[#allocation2] sm:$0xff]  ;;  %v207_v48 = vld [vmem:[#allocation2 + $0x8] sm:$0xff]  ;;  %v1424_v49 = vor.u32 %v1745_v44, %v1421_v45  ;;  %s2178_s22 = smov 127   ;;  %s2179_s2 = smov 1   ;;  %v209_v63 = vld [vmem:[#allocation5] sm:$0xff]  ;;  %vm477_vm0 = vcmask 523264  }
  0x39   :  { %399 = vmatpush.bf16.msra.mxu1 %v1484_v17  ;;  %v2316_v50 = vpack.c.bf16 %v207_v48, %v206_v47  ;;  %v2323_v51 = vld [vmem:[%s2511_s5] sm:$0x7]  ;;  %v213_v5 = vld [vmem:[#allocation8] sm:$0xff]  ;;  %v210_v7 = vld [vmem:[#allocation5 + $0x8] sm:$0xff]  ;;  %vm500_vm1 = vcmask 130048   ;;  %s2181_s24 = smov [#allocation19]  }
  0x3a   :  { %v249_v52 = vperm.slane %v2323_v51, 0  ;;  %v250_v53 = vperm.slane %v2323_v51, 1  ;;  %v211_v0 = vld [vmem:[#allocation7] sm:$0xff]  ;;  %v212_v9 = vld [vmem:[#allocation7 + $0x8] sm:$0xff]  ;;  %v214_v10 = vld [vmem:[#allocation8 + $0x8] sm:$0xff]  ;;  %s1397_s28 = sshll.u32 %s2181_s24, 4  ;;  %s1398_s28 = int_to_ptr.vmem [resolvable:$true] %s1397_s28 }
  0x3b   :  { %v1511_v44 = vld [vmem:[#allocation10 + $0xb0] sm:$0xf]  ;;  %v1768_v45 = vld [vmem:[#allocation10 + $0xb8] sm:$0xf0]  ;;  %s1399_s29 = sshll.u32 %s2521_s15, 4  ;;  %s1400_s29 = int_to_ptr.hbm [resolvable:$true] %s1399_s29 }
  0x3c   :  { %386 = vmatpush.bf16.msra.mxu0 %v1468_v22  ;;  %v1512_v48 = vor.u32 %v1768_v45, %v1511_v44 }
  0x3d   :  { %400 = vmatpush.bf16.msra.mxu1 %v1472_v23 }
  0x3e   :  { %411 = vmatpush.bf16.msra.mxu2 %v1512_v48 }
  0x40   :  { %387 = vmatpush.bf16.msra.mxu0 %v1456_v28 }
  0x41   :  { %401 = vmatpush.bf16.msra.mxu1 %v1460_v29 }
  0x44   :  { %388 = vmatpush.bf16.msra.mxu0 %v1444_v34 }
  0x45   :  { %402 = vmatpush.bf16.msra.mxu1 %v1448_v35 }
  0x48   :  { %389 = vmatpush.bf16.msra.mxu0 %v1432_v40 }
  0x49   :  { %403 = vmatpush.bf16.msra.mxu1 %v1436_v41 }
  0x4c   :  { %390 = vmatpush.bf16.msra.mxu0 %v1420_v46  ;;  %v1499_v46 = vld [vmem:[#allocation10 + $0x98] sm:$0xf] }
  0x4d   :  { %404 = vmatpush.bf16.msra.mxu1 %v1424_v49  ;;  %v1765_v49 = vld [vmem:[#allocation10 + $0xa0] sm:$0xf0] }
  0x4f   :  { %391 = vmatmul.bf16.vlgmr.msra.gmra.mxu0 %v2316_v50 }
  0x50   :  { %405 = vmatmul.bf16.vlgmr.msra.gmra.mxu1 %v2316_v50 }
  0xcc   :  { %v392_v54 = vpop.f32.mrf.mxu0 }
  0xcd   :  { %v393_v55 = vadd.f32 %v392_v54, %v249_v52  ;;  %v406_v56 = vpop.f32.mrf.mxu1  ;;  %v1487_v54 = vld [vmem:[#allocation10 + $0x80] sm:$0xf] }
  0xce   :  { %v407_v57 = vadd.f32 %v406_v56, %v250_v53 }
  0xcf   :  { %427 = vrot.lane.b32.xlu2 %v393_v55, %s2178_s22  ;;  %v425_v23 = vmul.f32 %v393_v55, %v209_v63 }
  0xd0   :  { %453 = vrot.lane.b32.xlu1 %v407_v57, %s2179_s2  ;;  %445 = vrot.lane.b32.xlu0 %v407_v57, %s2178_s22  ;;  %v443_v4 = vmul.f32 %v407_v57, %v209_v63  ;;  %v1463_v63 = vld [vmem:[#allocation10 + $0x50] sm:$0xf] }
  0xd4   :  { %v394_v58 = vpop.f32.mrf.mxu0 }
  0xd5   :  { %v395_v59 = vadd.f32 %v394_v58, %v249_v52  ;;  %v408_v60 = vpop.f32.mrf.mxu1  ;;  %v1475_v58 = vld [vmem:[#allocation10 + $0x68] sm:$0xf] }
  0xd6   :  { %v409_v61 = vadd.f32 %v408_v60, %v250_v53  ;;  %v1500_v53 = vor.u32 %v1765_v49, %v1499_v46 }
  0xd7   :  { %429 = vrot.lane.b32.xlu2 %v395_v59, %s2178_s22  ;;  %v426_v24 = vmul.f32 %v395_v59, %v210_v7 }
  0xd8   :  { %455 = vrot.lane.b32.xlu1 %v409_v61, %s2179_s2  ;;  %447 = vrot.lane.b32.xlu0 %v409_v61, %s2178_s22  ;;  %v444_v15 = vmul.f32 %v409_v61, %v210_v7 }
  0xd9   :  { %412 = vmatpush.bf16.msra.mxu2 %v1500_v53 }
  0xe0   :  { %437 = vrot.lane.b32.xlu1 %v395_v59, %s2179_s2  ;;  %435 = vrot.lane.b32.xlu0 %v393_v55, %s2179_s2  ;;  %v1762_v55 = vld [vmem:[#allocation10 + $0x88] sm:$0xf0]  ;;  %v1759_v59 = vld [vmem:[#allocation10 + $0x70] sm:$0xf0] }
  0xe1   :  { %v1488_v56 = vor.u32 %v1762_v55, %v1487_v54 }
  0xe3   :  { %413 = vmatpush.bf16.msra.mxu2 %v1488_v56 }
 0x129   :  { %v428_v62 = vpop.permute.xlu2 %427 }
 0x12a   :  { %v431_v19 = vmul.f32 %v428_v62, %v211_v0  ;;  %v1476_v62 = vor.u32 %v1759_v59, %v1475_v58 }
 0x12c   :  { %v433_v26 = vadd.f32 %v431_v19, %v425_v23  ;;  %414 = vmatpush.bf16.msra.mxu2 %v1476_v62 }
 0x131   :  { %v430_v13 = vpop.permute.xlu2 %429 }
 0x132   :  { %v432_v20 = vmul.f32 %v430_v13, %v212_v9 }
 0x134   :  { %v434_v27 = vadd.f32 %v432_v20, %v426_v24 }
 0x142   :  { %v454_v1 = vpop.permute.xlu1 %453  ;;  %v446_v2 = vpop.permute.xlu0 %445 }
 0x143   :  { %v449_v3 = vmul.f32 %v446_v2, %v211_v0  ;;  %v457_v8 = vmul.f32 %v454_v1, %v213_v5  ;;  %v1756_v0 = vld [vmem:[#allocation10 + $0x58] sm:$0xf0]  ;;  %v1451_v2 = vld [vmem:[#allocation10 + $0x38] sm:$0xf] }
 0x144   :  { %v1464_v1 = vor.u32 %v1756_v0, %v1463_v63 }
 0x145   :  { %v451_v6 = vadd.f32 %v449_v3, %v443_v4  ;;  %v1753_v3 = vld [vmem:[#allocation10 + $0x40] sm:$0xf0] }
 0x146   :  { %415 = vmatpush.bf16.msra.mxu2 %v1464_v1  ;;  %v1452_v4 = vor.u32 %v1753_v3, %v1451_v2 }
 0x147   :  { %v459_v14 = vadd.f32 %v457_v8, %v451_v6  ;;  %v1750_v6 = vld [vmem:[#allocation10 + $0x28] sm:$0xf0]  ;;  %v1427_v8 = vld [vmem:[#allocation10 + $0x8] sm:$0xf] }
 0x149   :  { %v463_v22 = vpack.c.bf16 %v459_v14, %v459_v14 }
 0x14a   :  { %v456_v11 = vpop.permute.xlu1 %455  ;;  %v448_v12 = vpop.permute.xlu0 %447  ;;  %416 = vmatpush.bf16.msra.mxu2 %v1452_v4  ;;  %v1776_v4 = vld [vmem:[#allocation11 + $0x38] sm:$0xff] }
 0x14b   :  { %v450_v16 = vmul.f32 %v448_v12, %v212_v9  ;;  %v458_v17 = vmul.f32 %v456_v11, %v214_v10  ;;  %v474_v32 = vunpack.c.l.b16 %v463_v22  ;;  %v1747_v9 = vld [vmem:[#allocation10 + $0x10] sm:$0xf0]  ;;  %v251_v22 = vperm.slane %v2323_v51, 2  ;;  %695 = vmatpush.bf16.msrb.mxu1 %v1776_v4 }
 0x14d   :  { %v452_v18 = vadd.f32 %v450_v16, %v444_v15 }
 0x14f   :  { %v460_v21 = vadd.f32 %v458_v17, %v452_v18 }
 0x151   :  { %v464_v25 = vpack.c.bf16 %v460_v21, %v460_v21 }
 0x152   :  { %v438_v28 = vpop.permute.xlu1 %437  ;;  %v436_v29 = vpop.permute.xlu0 %435 }
 0x153   :  { %v440_v30 = vmul.f32 %v438_v28, %v214_v10  ;;  %v439_v31 = vmul.f32 %v436_v29, %v213_v5  ;;  %v475_v33 = vunpack.c.l.b16 %v464_v25  ;;  %v1439_v5 = vld [vmem:[#allocation10 + $0x20] sm:$0xf]  ;;  %v1428_v10 = vor.u32 %v1747_v9, %v1427_v8  ;;  %v1772_v8 = vld [vmem:[#allocation11 + $0x18] sm:$0xff]  ;;  %v1771_v9 = vld [vmem:[#allocation11 + $0x10] sm:$0xff] }
 0x154   :  { %v1440_v7 = vor.u32 %v1750_v6, %v1439_v5  ;;  %v1775_v5 = vld [vmem:[#allocation11 + $0x30] sm:$0xff]  ;;  %v1774_v6 = vld [vmem:[#allocation11 + $0x28] sm:$0xff] }
 0x155   :  { %v442_v34 = vadd.f32 %v440_v30, %v434_v27  ;;  %v441_v35 = vadd.f32 %v439_v31, %v433_v26  ;;  %v2327_v36 = vpack.c.b16 %v475_v33, %v474_v32  ;;  %696 = vmatpush.bf16.msrb.mxu1 %v1775_v5 }
 0x156   :  { %417 = vmatpush.bf16.msra.mxu2 %v1440_v7  ;;  %v1773_v7 = vld [vmem:[#allocation11 + $0x20] sm:$0xff] }
 0x157   :  { %v462_v37 = vpack.c.bf16 %v442_v34, %v442_v34  ;;  %v461_v38 = vpack.c.bf16 %v441_v35, %v441_v35  ;;  %v482_v39 = vsel %vm477_vm0, %v2327_v36, 0 }
 0x158   :  { %491 = vmatpush.bf16.xpose.msrb.mxu0 %v482_v39 }
 0x159   :  { %v470_v40 = vunpack.c.l.b16 %v462_v37  ;;  %v469_v41 = vunpack.c.l.b16 %v461_v38  ;;  %697 = vmatpush.bf16.msrb.mxu1 %v1774_v6 }
 0x15a   :  { %418 = vmatpush.bf16.msra.mxu2 %v1428_v10 }
 0x15b   :  { %v471_v42 = vpack.c.b16 %v470_v40, %v469_v41 }
 0x15d   :  { %419 = vmatmul.bf16.vlgmr.msra.gmra.mxu2 %v2316_v50  ;;  %698 = vmatpush.bf16.msrb.mxu1 %v1773_v7 }
 0x15f   :  { %1513 = vmatmul.msk.bf16.vlgmr.msrb.gmra.mxu0 %vm477_vm0, %v471_v42 }
 0x161   :  { %699 = vmatpush.bf16.msrb.mxu1 %v1772_v8  ;;  %v1647_v8 = vld [vmem:[#allocation14 + $0x40] sm:$0xf] }
 0x165   :  { %700 = vmatpush.bf16.msrb.mxu1 %v1771_v9  ;;  %v1786_v9 = vld [vmem:[#allocation14 + $0x44] sm:$0xf0] }
 0x1dc   :  { %v493_v43 = vpop.f32.mrf.mxu0 }
 0x1dd   :  { %v498_v47 = vmul.f32 0.125, %v493_v43 }
 0x1df   :  { %v501_v52 = vsel %vm500_vm1, %v498_v47, -inf }
 0x1e0   :  { %502 = vmax.xlane.f32.xlu2 %v501_v52  ;;  %v420_v21 = vpop.f32.mrf.mxu2 }
 0x1e1   :  { %v421_v23 = vadd.f32 %v420_v21, %v251_v22  ;;  %v1806_v21 = vld [vmem:[#allocation16 + $0x64] sm:$0xf0] }
 0x1e3   :  { %v465_v24 = vpack.c.bf16 %v421_v23, %v421_v23  ;;  %v1805_v23 = vld [vmem:[#allocation16 + $0x64] sm:$0xf] }
 0x1e4   :  { %v495_v57 = vpop.f32.mrf.mxu0 }
 0x1e5   :  { %v499_v60 = vmul.f32 0.125, %v495_v57  ;;  %v526_v27 = vunpack.c.l.b16 %v465_v24  ;;  %v1601_v24 = vld [vmem:[#allocation16 + $0x68] sm:$0xf0] }
 0x1e7   :  { %v504_v61 = vsel %vm500_vm1, %v499_v60, -inf }
 0x1e8   :  { %505 = vmax.xlane.f32.xlu0 %v504_v61  ;;  %v422_v25 = vpop.f32.mrf.mxu2 }
 0x1e9   :  { %v423_v26 = vadd.f32 %v422_v25, %v251_v22  ;;  %v1671_v25 = vld [vmem:[#allocation14 + $0x70] sm:$0xf] }
 0x1eb   :  { %v466_v28 = vpack.c.bf16 %v423_v26, %v423_v26 }
 0x1ed   :  { %v527_v29 = vunpack.c.l.b16 %v466_v28  ;;  %v1791_v28 = vld [vmem:[#allocation14 + $0x74] sm:$0xf] }
 0x1ef   :  { %v528_v30 = vpack.c.b16 %v527_v29, %v526_v27  ;;  %v1792_v27 = vld [vmem:[#allocation14 + $0x74] sm:$0xf0]  ;;  %v1673_v29 = vld [vmem:[#allocation14 + $0x78] sm:$0xf0] }
 0x1f1   :  { %540 = vmatpush.bf16.msra.mxu3 %v528_v30 }
 0x1fc   :  { %547 = vrot.lane.b32.xlu0 %v471_v42, %s2167_s21 }
 0x253   :  { %v503_v11 = vpop.xlane.xlu2 %502 }
 0x254   :  { %v507_v12 = vsub.f32 %v498_v47, %v503_v11  ;;  %v1770_v11 = vld [vmem:[#allocation11 + $0x8] sm:$0xff] }
 0x255   :  { %701 = vmatpush.bf16.msrb.mxu1 %v1770_v11  ;;  %v1648_v11 = vor.u32 %v1786_v9, %v1647_v8 }
 0x256   :  { %v509_v13 = vmul.f32 1.442695, %v507_v12 }
 0x258   :  { %1852 = vpow2.f32 %v509_v13 }
 0x25b   :  { %v506_v14 = vpop.xlane.xlu0 %505 }
 0x25c   :  { %v508_v15 = vsub.f32 %v499_v60, %v506_v14  ;;  %v1769_v14 = vld [vmem:[#allocation11] sm:$0xff] }
 0x25d   :  { %702 = vmatpush.bf16.msrb.mxu1 %v1769_v14  ;;  %v1639_v14 = vld [vmem:[#allocation14 + $0x30] sm:$0xf] }
 0x25e   :  { %v1853_v16 = vpop.eup %1852  ;;  %v511_v17 = vmul.f32 1.442695, %v508_v15  ;;  %v1607_v15 = vld [vmem:[#allocation16 + $0x70] sm:$0xf] }
 0x25f   :  { %v513_v18 = vsel %vm500_vm1, %v1853_v16, 0.0 }
 0x260   :  { %1854 = vpow2.f32 %v511_v17  ;;  %514 = vadd.xlane.f32.xlu1 %v513_v18  ;;  %v1807_v17 = vld [vmem:[#allocation16 + $0x74] sm:$0xf] }
 0x266   :  { %v1855_v19 = vpop.eup %1854 }
 0x267   :  { %v516_v20 = vsel %vm500_vm1, %v1855_v19, 0.0 }
 0x268   :  { %517 = vadd.xlane.f32.xlu2 %v516_v20  ;;  %v1599_v20 = vld [vmem:[#allocation16 + $0x60] sm:$0xf] }
 0x269   :  { %v1600_v26 = vor.u32 %v1806_v21, %v1599_v20  ;;  %v1781_v20 = vld [vmem:[#allocation14 + $0x24] sm:$0xf] }
 0x26e   :  { %v548_v39 = vpop.permute.xlu0 %547 }
 0x280   :  { %549 = vrot.lane.b32.xlu2 %v2327_v36, %s2167_s21 }
 0x288   :  { %596 = vrot.lane.b32.xlu2 %v528_v30, %s2167_s21  ;;  %v1604_v30 = vor.u32 %v1805_v23, %v1601_v24  ;;  %v1567_v23 = vld [vmem:[#allocation16 + $0x20] sm:$0xf]  ;;  %v1798_v24 = vld [vmem:[#allocation16 + $0x24] sm:$0xf0] }
 0x2d3   :  { %v515_v31 = vpop.xlane.xlu1 %514 }
 0x2d4   :  { %1856 = vrcp.f32 %v515_v31  ;;  %v1672_v31 = vor.u32 %v1792_v27, %v1671_v25  ;;  %v1797_v25 = vld [vmem:[#allocation16 + $0x24] sm:$0xf]  ;;  %v1568_v27 = vor.u32 %v1798_v24, %v1567_v23  ;;  %v2180_v23 = vmov 256.0  }
 0x2da   :  { %v1857_v33 = vpop.eup %1856 }
 0x2db   :  { %v518_v32 = vpop.xlane.xlu2 %517  ;;  %v521_v36 = vmul.f32 %v1857_v33, %v1853_v16  ;;  %v1808_v16 = vld [vmem:[#allocation16 + $0x74] sm:$0xf0]  ;;  %v1591_v33 = vld [vmem:[#allocation16 + $0x50] sm:$0xf] }
 0x2dc   :  { %1858 = vrcp.f32 %v518_v32  ;;  %v1608_v18 = vor.u32 %v1808_v16, %v1607_v15  ;;  %v1676_v32 = vor.u32 %v1791_v28, %v1673_v29  ;;  %v1784_v15 = vld [vmem:[#allocation14 + $0x34] sm:$0xf0]  ;;  %v1783_v16 = vld [vmem:[#allocation14 + $0x34] sm:$0xf]  ;;  %v1569_v28 = vld [vmem:[#allocation16 + $0x28] sm:$0xf0] }
 0x2dd   :  { %v1572_v29 = vor.u32 %v1797_v25, %v1569_v28 }
 0x2de   :  { %822 = vmatpush.bf16.msrb.mxu2 %v1608_v18  ;;  %944 = vmatpush.bf16.msra.mxu1 %v1676_v32  ;;  %v1641_v18 = vld [vmem:[#allocation14 + $0x38] sm:$0xf0]  ;;  %v1795_v32 = vld [vmem:[#allocation16 + $0x14] sm:$0xf] }
 0x2e2   :  { %v1859_v34 = vpop.eup %1858  ;;  %823 = vmatpush.bf16.msrb.mxu2 %v1600_v26 }
 0x2e3   :  { %v550_v35 = vpop.permute.xlu2 %549  ;;  %v522_v51 = vmul.f32 %v1859_v34, %v1855_v19  ;;  %v1609_v19 = vld [vmem:[#allocation16 + $0x78] sm:$0xf0]  ;;  %v1804_v34 = vld [vmem:[#allocation16 + $0x54] sm:$0xf0] }
 0x2e4   :  { %v555_v37 = vsel %vm477_vm0, %v550_v35, 0  ;;  %v1612_v22 = vor.u32 %v1807_v17, %v1609_v19  ;;  %v1803_v35 = vld [vmem:[#allocation16 + $0x54] sm:$0xf]  ;;  %v1640_v17 = vor.u32 %v1784_v15, %v1639_v14  ;;  %v1644_v19 = vor.u32 %v1783_v16, %v1641_v18 }
 0x2e5   :  { %564 = vmatpush.bf16.xpose.msrb.mxu3 %v555_v37  ;;  %v523_v38 = vpack.c.bf16 %v522_v51, %v521_v36  ;;  %v1593_v36 = vld [vmem:[#allocation16 + $0x58] sm:$0xf0]  ;;  %v1663_v51 = vld [vmem:[#allocation14 + $0x60] sm:$0xf]  ;;  %v1790_v37 = vld [vmem:[#allocation14 + $0x64] sm:$0xf0] }
 0x2e7   :  { %1514 = vmatmul.msk.bf16.vlgmr.msra.gmra.mxu3 %vm500_vm1, %v523_v38  ;;  %v1664_v38 = vor.u32 %v1790_v37, %v1663_v51 }
 0x2eb   :  { %v597_v40 = vpop.permute.xlu2 %596 }
 0x2ec   :  { %609 = vmatpush.bf16.msra.mxu0 %v597_v40  ;;  %v1665_v40 = vld [vmem:[#allocation14 + $0x68] sm:$0xf0] }
 0x2ed   :  { %836 = vmatpush.bf16.msra.mxu3 %v1612_v22  ;;  %v1633_v22 = vld [vmem:[#allocation14 + $0x28] sm:$0xf0] }
 0x2ee   :  { %v1636_v26 = vor.u32 %v1781_v20, %v1633_v22 }
 0x2f0   :  { %930 = vmatpush.bf16.msrb.mxu0 %v1672_v31  ;;  %v1796_v31 = vld [vmem:[#allocation16 + $0x14] sm:$0xf0] }
 0x2f1   :  { %837 = vmatpush.bf16.msra.mxu3 %v1604_v30  ;;  %v1559_v30 = vld [vmem:[#allocation16 + $0x10] sm:$0xf] }
 0x2f4   :  { %931 = vmatpush.bf16.msrb.mxu0 %v1664_v38  ;;  %v1779_v38 = vld [vmem:[#allocation14 + $0x14] sm:$0xf] }
 0x2f7   :  { %1515 = vmatmul.msk.bf16.vlgmr.msrb.gmra.mxu3 %vm477_vm0, %v548_v39  ;;  %v1789_v39 = vld [vmem:[#allocation14 + $0x64] sm:$0xf] }
 0x36a   :  { %v2345_v41 = vpop.f32.mrf.mxu3 }
 0x372   :  { %v2347_v42 = vpop.f32.mrf.mxu3 }
 0x37a   :  { %v566_v43 = vpop.f32.mrf.mxu3 }
 0x37b   :  { %v571_v44 = vmul.f32 0.125, %v566_v43  ;;  %v1592_v43 = vor.u32 %v1804_v34, %v1591_v33  ;;  %v1560_v33 = vor.u32 %v1796_v31, %v1559_v30  ;;  %v1561_v34 = vld [vmem:[#allocation16 + $0x18] sm:$0xf0] }
 0x37c   :  { %v1564_v51 = vor.u32 %v1795_v32, %v1561_v34 }
 0x37d   :  { %v573_v45 = vsel %vm500_vm1, %v571_v44, -inf  ;;  %824 = vmatpush.bf16.msrb.mxu2 %v1592_v43  ;;  %v1615_v43 = vld [vmem:[#allocation14] sm:$0xf] }
 0x37e   :  { %574 = vmax.xlane.f32.xlu1 %v573_v45  ;;  %v1583_v45 = vld [vmem:[#allocation16 + $0x40] sm:$0xf] }
 0x382   :  { %v568_v46 = vpop.f32.mrf.mxu3 }
 0x383   :  { %v572_v47 = vmul.f32 0.125, %v568_v46  ;;  %v1802_v46 = vld [vmem:[#allocation16 + $0x44] sm:$0xf0] }
 0x385   :  { %v576_v48 = vsel %vm500_vm1, %v572_v47, -inf }
 0x386   :  { %577 = vmax.xlane.f32.xlu1 %v576_v48  ;;  %v1655_v48 = vld [vmem:[#allocation14 + $0x50] sm:$0xf] }
 0x3f1   :  { %v575_v49 = vpop.xlane.xlu1 %574 }
 0x3f2   :  { %v579_v52 = vsub.f32 %v571_v44, %v575_v49  ;;  %v1668_v44 = vor.u32 %v1789_v39, %v1665_v40  ;;  %v1788_v49 = vld [vmem:[#allocation14 + $0x54] sm:$0xf0]  ;;  %v1625_v39 = vld [vmem:[#allocation14 + $0x18] sm:$0xf0] }
 0x3f3   :  { %v1628_v40 = vor.u32 %v1779_v38, %v1625_v39  ;;  %v1815_v38 = vld [vmem:[#allocation17 + $0x30] sm:$0xff] }
 0x3f4   :  { %v581_v53 = vmul.f32 1.442695, %v579_v52  ;;  %v1787_v52 = vld [vmem:[#allocation14 + $0x54] sm:$0xf]  ;;  %945 = vmatpush.bf16.msra.mxu1 %v1668_v44  ;;  %v1778_v44 = vld [vmem:[#allocation14 + $0x4] sm:$0xf0] }
 0x3f6   :  { %1860 = vpow2.f32 %v581_v53  ;;  %v1801_v53 = vld [vmem:[#allocation16 + $0x44] sm:$0xf] }
 0x3f9   :  { %v578_v54 = vpop.xlane.xlu1 %577 }
 0x3fa   :  { %v580_v55 = vsub.f32 %v572_v47, %v578_v54  ;;  %v1596_v47 = vor.u32 %v1803_v35, %v1593_v36  ;;  %v1585_v54 = vld [vmem:[#allocation16 + $0x48] sm:$0xf0]  ;;  %v1623_v35 = vld [vmem:[#allocation14 + $0x10] sm:$0xf]  ;;  %v1780_v36 = vld [vmem:[#allocation14 + $0x14] sm:$0xf0] }
 0x3fb   :  { %v1624_v37 = vor.u32 %v1780_v36, %v1623_v35  ;;  %v1816_v36 = vld [vmem:[#allocation17 + $0x38] sm:$0xff] }
 0x3fc   :  { %v1861_v56 = vpop.eup %1860  ;;  %v583_v57 = vmul.f32 1.442695, %v580_v55  ;;  %v1657_v55 = vld [vmem:[#allocation14 + $0x58] sm:$0xf0]  ;;  %838 = vmatpush.bf16.msra.mxu3 %v1596_v47  ;;  %v1617_v47 = vld [vmem:[#allocation14 + $0x8] sm:$0xf0] }
 0x3fd   :  { %v585_v58 = vsel %vm500_vm1, %v1861_v56, 0.0 }
 0x3fe   :  { %1862 = vpow2.f32 %v583_v57  ;;  %586 = vadd.xlane.f32.xlu1 %v585_v58  ;;  %v1660_v57 = vor.u32 %v1787_v52, %v1657_v55  ;;  %v1584_v58 = vor.u32 %v1802_v46, %v1583_v45  ;;  %v1777_v45 = vld [vmem:[#allocation14 + $0x4] sm:$0xf]  ;;  %v1616_v46 = vor.u32 %v1778_v44, %v1615_v43  ;;  %v1553_v55 = vld [vmem:[#allocation16 + $0x8] sm:$0xf0] }
 0x3ff   :  { %v1793_v52 = vld [vmem:[#allocation16 + $0x4] sm:$0xf] }
 0x400   :  { %946 = vmatpush.bf16.msra.mxu1 %v1660_v57  ;;  %825 = vmatpush.bf16.msrb.mxu2 %v1584_v58  ;;  %v1850_v58 = vld [vmem:[#allocation13] ss:$0 sm:$0xff] }
 0x404   :  { %v1863_v59 = vpop.eup %1862 }
 0x405   :  { %v588_v60 = vsel %vm500_vm1, %v1863_v59, 0.0 }
 0x406   :  { %589 = vadd.xlane.f32.xlu0 %v588_v60  ;;  %v1575_v60 = vld [vmem:[#allocation16 + $0x30] sm:$0xf] }
 0x471   :  { %v587_v61 = vpop.xlane.xlu1 %586 }
 0x472   :  { %1864 = vrcp.f32 %v587_v61  ;;  %v1800_v61 = vld [vmem:[#allocation16 + $0x34] sm:$0xf0] }
 0x478   :  { %v1865_v63 = vpop.eup %1864 }
 0x479   :  { %v590_v62 = vpop.xlane.xlu0 %589  ;;  %v593_v1 = vmul.f32 %v1865_v63, %v1861_v56  ;;  %v1656_v56 = vor.u32 %v1788_v49, %v1655_v48  ;;  %v1577_v63 = vld [vmem:[#allocation16 + $0x38] sm:$0xf0]  ;;  %v1551_v48 = vld [vmem:[#allocation16] sm:$0xf]  ;;  %v1794_v49 = vld [vmem:[#allocation16 + $0x4] sm:$0xf0] }
 0x47a   :  { %1866 = vrcp.f32 %v590_v62  ;;  %v1799_v62 = vld [vmem:[#allocation16 + $0x34] sm:$0xf] }
 0x47b   :  { %932 = vmatpush.bf16.msrb.mxu0 %v1656_v56  ;;  %v1556_v56 = vor.u32 %v1793_v52, %v1553_v55  ;;  %1868 = vrcp.f32 %v2180_v23 }
 0x47f   :  { %933 = vmatpush.bf16.msrb.mxu0 %v1648_v11 }
 0x480   :  { %v1867_v0 = vpop.eup %1866 }
 0x481   :  { %v594_v2 = vmul.f32 %v1867_v0, %v1863_v59  ;;  %v1588_v59 = vor.u32 %v1801_v53, %v1585_v54  ;;  %v1576_v0 = vor.u32 %v1800_v61, %v1575_v60  ;;  %v1620_v53 = vor.u32 %v1777_v45, %v1617_v47  ;;  %v1869_v24 = vpop.eup %1868  ;;  %v1814_v47 = vld [vmem:[#allocation17 + $0x28] sm:$0xff] }
 0x482   :  { %v1552_v54 = vor.u32 %v1794_v49, %v1551_v48  ;;  %v975_v25 = vmul.f32 256.0, %v1869_v24  ;;  %vm979_vm2 = vweird.f32 %v1869_v24  ;;  %v1822_v48 = vld [vmem:[#allocation17 + $0x68] sm:$0xff] }
 0x483   :  { %v595_v3 = vpack.c.bf16 %v594_v2, %v593_v1  ;;  %839 = vmatpush.bf16.msra.mxu3 %v1588_v59  ;;  %v1580_v1 = vor.u32 %v1799_v62, %v1577_v63  ;;  %826 = vmatpush.bf16.msrb.mxu2 %v1576_v0  ;;  %v958_v63 = vld [vmem:[%s2516_s10] sm:$0x3] }
 0x484   :  { %934 = vmatpush.bf16.msrb.mxu0 %v1640_v17 }
 0x485   :  { %1516 = vmatmul.msk.bf16.vlgmr.msra.gmra.mxu0 %vm500_vm1, %v595_v3 }
 0x487   :  { %840 = vmatpush.bf16.msra.mxu3 %v1580_v1  ;;  %827 = vmatpush.bf16.msrb.mxu2 %v1568_v27 }
 0x48b   :  { %841 = vmatpush.bf16.msra.mxu3 %v1572_v29  ;;  %828 = vmatpush.bf16.msrb.mxu2 %v1560_v33 }
 0x48f   :  { %842 = vmatpush.bf16.msra.mxu3 %v1564_v51  ;;  %829 = vmatpush.bf16.msrb.mxu2 %v1552_v54  ;;  %v1824_v51 = vld [vmem:[#allocation17 + $0x78] sm:$0xff]  ;;  %v1813_v54 = vld [vmem:[#allocation17 + $0x20] sm:$0xff] }
 0x493   :  { %843 = vmatpush.bf16.msra.mxu3 %v1556_v56  ;;  %1355 = vmatpush.bf16.msra.mxu2 %v1816_v36  ;;  %v1821_v56 = vld [vmem:[#allocation17 + $0x60] sm:$0xff] }
 0x497   :  { %1369 = vmatpush.bf16.msrb.mxu3 %v1824_v51  ;;  %1356 = vmatpush.bf16.msra.mxu2 %v1815_v38 }
 0x49b   :  { %1357 = vmatpush.bf16.msra.mxu2 %v1814_v47 }
 0x49f   :  { %1358 = vmatpush.bf16.msra.mxu2 %v1813_v54 }
 0x502   :  { %v611_v10 = vpop.f32.mrf.mxu0 }
 0x50a   :  { %v613_v12 = vpop.f32.mrf.mxu0 }
 0x50b   :  { %v1845_v13 = vpack.i.bf16 %v613_v12, %v611_v10  ;;  %v1785_v10 = vld [vmem:[#allocation14 + $0x44] sm:$0xf]  ;;  %v1649_v12 = vld [vmem:[#allocation14 + $0x48] sm:$0xf0] }
 0x50d   :  { %1846 = vrot.lane.b32.xlu1 %v1845_v13, %s2167_s21  ;;  %v1652_v13 = vor.u32 %v1785_v10, %v1649_v12 }
 0x50f   :  { %947 = vmatpush.bf16.msra.mxu1 %v1652_v13 }
 0x513   :  { %948 = vmatpush.bf16.msra.mxu1 %v1644_v19 }
 0x517   :  { %949 = vmatpush.bf16.msra.mxu1 %v1636_v26  ;;  %v976_v26 = vsub.f32 1.0, %v975_v25 }
 0x519   :  { %v977_v27 = vmul.f32 %v1869_v24, %v976_v26 }
 0x51b   :  { %950 = vmatpush.bf16.msra.mxu1 %v1628_v40  ;;  %v978_v28 = vadd.f32 %v1869_v24, %v977_v27  ;;  %v1823_v40 = vld [vmem:[#allocation17 + $0x70] sm:$0xff] }
 0x51c   :  { %1370 = vmatpush.bf16.msrb.mxu3 %v1823_v40 }
 0x51d   :  { %v980_v29 = vsel %vm979_vm2, %v1869_v24, %v978_v28  ;;  %v1817_v24 = vld [vmem:[#allocation17 + $0x40] sm:$0xff] }
 0x51f   :  { %951 = vmatpush.bf16.msra.mxu1 %v1620_v53 }
 0x520   :  { %1371 = vmatpush.bf16.msrb.mxu3 %v1822_v48 }
 0x524   :  { %1372 = vmatpush.bf16.msrb.mxu3 %v1821_v56 }
 0x57f   :  { %v1847_v2 = vpop.permute.xlu1 %1846 }
 0x580   :  { %v1849_v3 = vunpack.i.h.bf16 %v1847_v2  ;;  %v1848_v4 = vunpack.i.l.bf16 %v1847_v2  ;;  %v960_v2 = vperm.slane %v958_v63, 0 }
 0x582   :  { %v624_v5 = vsel %vm477_vm0, %v2345_v41, %v1848_v4  ;;  %v625_v6 = vsel %vm477_vm0, %v2347_v42, %v1849_v3  ;;  %v1631_v41 = vld [vmem:[#allocation14 + $0x20] sm:$0xf]  ;;  %v1782_v42 = vld [vmem:[#allocation14 + $0x24] sm:$0xf0]  ;;  %v961_v3 = vperm.slane %v958_v63, 1 }
 0x583   :  { %v626_v7 = vpack.c.bf16 %v625_v6, %v624_v5  ;;  %v1632_v21 = vor.u32 %v1782_v42, %v1631_v41 }
 0x585   :  { %703 = vmatmul.bf16.vlgmr.msrb.gmra.mxu1 %v626_v7  ;;  %935 = vmatpush.bf16.msrb.mxu0 %v1632_v21 }
 0x589   :  { %936 = vmatpush.bf16.msrb.mxu0 %v1624_v37 }
 0x58d   :  { %937 = vmatpush.bf16.msrb.mxu0 %v1616_v46 }
 0x590   :  { %938 = vmatmul.bf16.vlgmr.msrb.gmra.mxu0 %v2316_v50 }
 0x595   :  { %952 = vmatmul.bf16.vlgmr.msra.gmra.mxu1 %v2316_v50 }
 0x602   :  { %v704_v57 = vpop.f32.mrf.mxu1 }
 0x603   :  { %v705_v60 = vadd.f32 %v1850_v58, %v704_v57 }
 0x60a   :  { %v706_v59 = vpop.f32.mrf.mxu1 }
 0x60b   :  { %v707_v61 = vadd.f32 %v1850_v58, %v706_v59  ;;  %v1812_v58 = vld [vmem:[#allocation17 + $0x18] sm:$0xff] }
 0x60c   :  { %1359 = vmatpush.bf16.msra.mxu2 %v1812_v58 }
 0x60d   :  { %v725_v62 = vpack.c.bf16 %v707_v61, %v705_v60  ;;  %v939_v0 = vpop.f32.mrf.mxu0  ;;  %v1820_v60 = vld [vmem:[#allocation17 + $0x58] sm:$0xff] }
 0x60e   :  { %v1029_v61 = vld [vmem:[%s2517_s11] sm:$0x3]  ;;  %1373 = vmatpush.bf16.msrb.mxu3 %v1820_v60 }
 0x60f   :  { %830 = vmatmul.bf16.vlgmr.msrb.gmra.mxu2 %v725_v62  ;;  %844 = vmatmul.bf16.vlgmr.msra.gmra.mxu3 %v725_v62 }
 0x612   :  { %v953_v1 = vpop.f32.mrf.mxu1 }
 0x615   :  { %v941_v12 = vpop.f32.mrf.mxu0 }
 0x61a   :  { %v955_v13 = vpop.f32.mrf.mxu1 }
 0x692   :  { %v831_v4 = vpop.f32.mrf.mxu2  ;;  %v845_v5 = vpop.f32.mrf.mxu3 }
 0x693   :  { %v940_v6 = vadd.f32 %v939_v0, %v831_v4  ;;  %v954_v50 = vadd.f32 %v953_v1, %v845_v5  ;;  %v1811_v0 = vld [vmem:[#allocation17 + $0x10] sm:$0xff]  ;;  %v1039_v4 = vld [vmem:[%s2518_s12] sm:$0x3] }
 0x694   :  { %1360 = vmatpush.bf16.msra.mxu2 %v1811_v0 }
 0x695   :  { %v2364_v7 = vadd.f32 %v960_v2, %v940_v6  ;;  %v2366_v8 = vadd.f32 %v961_v3, %v954_v50  ;;  %v1031_v50 = vperm.slane %v1029_v61, 0 }
 0x697   :  { %v968_v9 = vadd.f32 %v2366_v8, %v2364_v7  ;;  %v983_v10 = vmul.f32 %v2364_v7, %v2364_v7  ;;  %v984_v11 = vmul.f32 %v2366_v8, %v2366_v8 }
 0x699   :  { %969 = vadd.xlane.f32.xlu2 %v968_v9  ;;  %v987_v14 = vadd.f32 %v984_v11, %v983_v10  ;;  %v1032_v9 = vperm.slane %v1029_v61, 1 }
 0x69a   :  { %v833_v15 = vpop.f32.mrf.mxu2  ;;  %v847_v16 = vpop.f32.mrf.mxu3 }
 0x69b   :  { %v942_v17 = vadd.f32 %v941_v12, %v833_v15  ;;  %v956_v18 = vadd.f32 %v955_v13, %v847_v16  ;;  %988 = vadd.xlane.f32.xlu0 %v987_v14  ;;  %v1810_v14 = vld [vmem:[#allocation17 + $0x8] sm:$0xff]  ;;  %v1041_v15 = vperm.slane %v1039_v4, 0  ;;  %v1042_v16 = vperm.slane %v1039_v4, 1 }
 0x69c   :  { %1361 = vmatpush.bf16.msra.mxu2 %v1810_v14 }
 0x69d   :  { %v2374_v19 = vadd.f32 %v960_v2, %v942_v17  ;;  %v2376_v41 = vadd.f32 %v961_v3, %v956_v18  ;;  %v1819_v3 = vld [vmem:[#allocation17 + $0x50] sm:$0xff]  ;;  %v1818_v18 = vld [vmem:[#allocation17 + $0x48] sm:$0xff] }
 0x69e   :  { %1374 = vmatpush.bf16.msrb.mxu3 %v1819_v3 }
 0x69f   :  { %v971_v42 = vadd.f32 %v2376_v41, %v2374_v19  ;;  %v985_v20 = vmul.f32 %v2374_v19, %v2374_v19  ;;  %v986_v21 = vmul.f32 %v2376_v41, %v2376_v41 }
 0x6a1   :  { %972 = vadd.xlane.f32.xlu1 %v971_v42  ;;  %v990_v22 = vadd.f32 %v986_v21, %v985_v20 }
 0x6a2   :  { %1375 = vmatpush.bf16.msrb.mxu3 %v1818_v18 }
 0x6a3   :  { %991 = vadd.xlane.f32.xlu0 %v990_v22 }
 0x6a6   :  { %1376 = vmatpush.bf16.msrb.mxu3 %v1817_v24 }
 0x70c   :  { %v970_v30 = vpop.xlane.xlu2 %969 }
 0x70d   :  { %v981_v31 = vmul.f32 %v980_v29, %v970_v30 }
 0x70e   :  { %v989_v32 = vpop.xlane.xlu0 %988 }
 0x70f   :  { %v993_v33 = vmul.f32 %v989_v32, %v980_v29  ;;  %v995_v34 = vmul.f32 %v981_v31, %v981_v31  ;;  %v999_v5 = vsub.f32 %v2364_v7, %v981_v31  ;;  %v1000_v6 = vsub.f32 %v2366_v8, %v981_v31  ;;  %v1809_v7 = vld [vmem:[#allocation17] sm:$0xff] }
 0x710   :  { %1362 = vmatpush.bf16.msra.mxu2 %v1809_v7 }
 0x711   :  { %v997_v35 = vsub.f32 %v993_v33, %v995_v34 }
 0x713   :  { %v1003_v37 = vadd.f32 1e-05, %v997_v35 }
 0x714   :  { %v973_v39 = vpop.xlane.xlu1 %972 }
 0x715   :  { %1870 = vrsqrt.f32 %v1003_v37  ;;  %v2384_v43 = vmul.f32 %v980_v29, %v973_v39  ;;  %vm1011_vm4 = vweird.f32 %v1003_v37 }
 0x716   :  { %v992_v44 = vpop.xlane.xlu0 %991 }
 0x717   :  { %v996_v45 = vmul.f32 %v2384_v43, %v2384_v43  ;;  %v994_v46 = vmul.f32 %v992_v44, %v980_v29  ;;  %v1001_v25 = vsub.f32 %v2374_v19, %v2384_v43  ;;  %v1002_v26 = vsub.f32 %v2376_v41, %v2384_v43 }
 0x719   :  { %v998_v49 = vsub.f32 %v994_v46, %v996_v45 }
 0x71b   :  { %v1871_v52 = vpop.eup %1870  ;;  %v1004_v53 = vadd.f32 1e-05, %v998_v49 }
 0x71c   :  { %v1006_v55 = vmul.f32 %v1871_v52, %v1003_v37  ;;  %vm1012_vm3 = vweird.f32 %v1871_v52 }
 0x71d   :  { %1872 = vrsqrt.f32 %v1004_v53  ;;  %vm1013_vm5 = vmor %vm1011_vm4, %vm1012_vm3  ;;  %vm1021_vm7 = vweird.f32 %v1004_v53 }
 0x71e   :  { %v1007_v57 = vmul.f32 %v1871_v52, %v1006_v55 }
 0x720   :  { %v1008_v59 = vmul.f32 0.5, %v1007_v57 }
 0x722   :  { %v1009_v62 = vsub.f32 1.5, %v1008_v59 }
 0x723   :  { %v1873_v63 = vpop.eup %1872 }
 0x724   :  { %v1010_v1 = vmul.f32 %v1871_v52, %v1009_v62  ;;  %v1016_v2 = vmul.f32 %v1873_v63, %v1004_v53  ;;  %vm1022_vm6 = vweird.f32 %v1873_v63 }
 0x725   :  { %vm1023_vm8 = vmor %vm1021_vm7, %vm1022_vm6 }
 0x726   :  { %v1014_v10 = vsel %vm1013_vm5, %v1871_v52, %v1010_v1  ;;  %v1017_v11 = vmul.f32 %v1873_v63, %v1016_v2 }
 0x727   :  { %v1025_v12 = vmul.f32 %v1014_v10, %v999_v5  ;;  %v1026_v13 = vmul.f32 %v1014_v10, %v1000_v6 }
 0x728   :  { %v1018_v17 = vmul.f32 0.5, %v1017_v11 }
 0x729   :  { %v1035_v42 = vmul.f32 %v1031_v50, %v1025_v12  ;;  %v1036_v20 = vmul.f32 %v1032_v9, %v1026_v13 }
 0x72a   :  { %v1019_v21 = vsub.f32 1.5, %v1018_v17 }
 0x72b   :  { %v2396_v8 = vadd.f32 %v1041_v15, %v1035_v42  ;;  %v2398_v22 = vadd.f32 %v1042_v16, %v1036_v20 }
 0x72c   :  { %v1020_v23 = vmul.f32 %v1873_v63, %v1019_v21 }
 0x72d   :  { %v2405_v27 = vmul.f32 0.70710677, %v2396_v8  ;;  %v2408_v28 = vmul.f32 0.70710677, %v2398_v22 }
 0x72e   :  { %v1024_v29 = vsel %vm1023_vm8, %v1873_v63, %v1020_v23 }
 0x72f   :  { %v1027_v30 = vmul.f32 %v1024_v29, %v1001_v25  ;;  %v1028_v31 = vmul.f32 %v1024_v29, %v1002_v26  ;;  %v1057_v32 = vmul.f32 %v2405_v27, %v2405_v27  ;;  %v1097_v19 = vmul.f32 %v2408_v28, %v2408_v28 }
 0x731   :  { %v1037_v33 = vmul.f32 %v1031_v50, %v1027_v30  ;;  %v1038_v41 = vmul.f32 %v1032_v9, %v1028_v31  ;;  %v2414_v34 = vmin.f32 %v1057_v32, 16.0  ;;  %v2416_v35 = vmin.f32 %v1097_v19, 16.0 }
 0x733   :  { %v2418_v36 = vadd.f32 %v1041_v15, %v1037_v33  ;;  %v1059_v51 = vmul.f32 2.1237322e-06, %v2414_v34  ;;  %v1070_v37 = vmul.f32 3.8918573e-05, %v2414_v34  ;;  %v2422_v38 = vadd.f32 %v1042_v16, %v1038_v41 }
 0x734   :  { %v1099_v39 = vmul.f32 2.1237322e-06, %v2416_v35  ;;  %v1110_v40 = vmul.f32 3.8918573e-05, %v2416_v35 }
 0x735   :  { %v2427_v43 = vmul.f32 0.70710677, %v2418_v36  ;;  %v1060_v44 = vadd.f32 0.00028619796, %v1059_v51  ;;  %v1071_v45 = vadd.f32 0.001143296, %v1070_v37 }
 0x736   :  { %v2430_v46 = vmul.f32 0.70710677, %v2422_v38  ;;  %v1100_v49 = vadd.f32 0.00028619796, %v1099_v39  ;;  %v1111_v52 = vadd.f32 0.001143296, %v1110_v40 }
 0x737   :  { %v1061_v47 = vmul.f32 %v1060_v44, %v2414_v34  ;;  %v1137_v48 = vmul.f32 %v2427_v43, %v2427_v43  ;;  %v1072_v53 = vmul.f32 %v1071_v45, %v2414_v34 }
 0x738   :  { %v1177_v54 = vmul.f32 %v2430_v46, %v2430_v46  ;;  %v1112_v57 = vmul.f32 %v1111_v52, %v2416_v35  ;;  %v1101_v62 = vmul.f32 %v1100_v49, %v2416_v35 }
 0x739   :  { %v1062_v55 = vadd.f32 0.0036580483, %v1061_v47  ;;  %v2438_v56 = vmin.f32 %v1137_v48, 16.0  ;;  %v1073_v58 = vadd.f32 0.014752088, %v1072_v53 }
 0x73a   :  { %v2441_v59 = vmin.f32 %v1177_v54, 16.0  ;;  %v1113_v63 = vadd.f32 0.014752088, %v1112_v57  ;;  %v1102_v11 = vadd.f32 0.0036580483, %v1101_v62 }
 0x73b   :  { %v1139_v60 = vmul.f32 2.1237322e-06, %v2438_v56  ;;  %v1150_v61 = vmul.f32 3.8918573e-05, %v2438_v56  ;;  %v1063_v0 = vmul.f32 %v1062_v55, %v2414_v34  ;;  %v1074_v1 = vmul.f32 %v1073_v58, %v2414_v34 }
 0x73c   :  { %v1190_v2 = vmul.f32 3.8918573e-05, %v2441_v59  ;;  %v1114_v5 = vmul.f32 %v1113_v63, %v2416_v35  ;;  %v1179_v6 = vmul.f32 2.1237322e-06, %v2441_v59  ;;  %v1103_v23 = vmul.f32 %v1102_v11, %v2416_v35 }
 0x73d   :  { %v1140_v3 = vadd.f32 0.00028619796, %v1139_v60  ;;  %v1151_v4 = vadd.f32 0.001143296, %v1150_v61  ;;  %v1075_v50 = vadd.f32 0.112945676, %v1074_v1 }
 0x73e   :  { %v1115_v12 = vadd.f32 0.112945676, %v1114_v5  ;;  %v1064_v13 = vadd.f32 0.05243302, %v1063_v0  ;;  %v1191_v15 = vadd.f32 0.001143296, %v1190_v2 }
 0x73f   :  { %v1141_v9 = vmul.f32 %v1140_v3, %v2438_v56  ;;  %v1152_v10 = vmul.f32 %v1151_v4, %v2438_v56  ;;  %v1076_v14 = vmul.f32 %v1075_v50, %v2414_v34  ;;  %v1180_v42 = vadd.f32 0.00028619796, %v1179_v6 }
 0x740   :  { %v1116_v18 = vmul.f32 %v1115_v12, %v2416_v35  ;;  %v1192_v21 = vmul.f32 %v1191_v15, %v2441_v59  ;;  %v1065_v25 = vmul.f32 %v1064_v13, %v2414_v34  ;;  %v1104_v51 = vadd.f32 0.05243302, %v1103_v23 }
 0x741   :  { %v1142_v16 = vadd.f32 0.0036580483, %v1141_v9  ;;  %v1153_v17 = vadd.f32 0.014752088, %v1152_v10  ;;  %v1077_v20 = vadd.f32 0.4994258, %v1076_v14  ;;  %v1181_v19 = vmul.f32 %v1180_v42, %v2441_v59 }
 0x742   :  { %v1117_v24 = vadd.f32 0.4994258, %v1116_v18  ;;  %v1193_v30 = vadd.f32 0.014752088, %v1192_v21  ;;  %v1066_v39 = vadd.f32 0.18741608, %v1065_v25  ;;  %v1105_v53 = vmul.f32 %v1104_v51, %v2416_v35 }
 0x743   :  { %v1154_v7 = vmul.f32 %v1153_v17, %v2438_v56  ;;  %v1078_v26 = vmul.f32 %v1077_v20, %v2414_v34  ;;  %v1143_v29 = vmul.f32 %v1142_v16, %v2438_v56  ;;  %v1182_v47 = vadd.f32 0.0036580483, %v1181_v19 }
 0x744   :  { %v1118_v32 = vmul.f32 %v1117_v24, %v2416_v35  ;;  %v1194_v44 = vmul.f32 %v1193_v30, %v2441_v59  ;;  %v1067_v49 = vmul.f32 %v1066_v39, %v2414_v34  ;;  %v1106_v1 = vadd.f32 0.18741608, %v1105_v53 }
 0x745   :  { %v1155_v31 = vadd.f32 0.112945676, %v1154_v7  ;;  %v1079_v33 = vadd.f32 1.0, %v1078_v26  ;;  %v1144_v40 = vadd.f32 0.05243302, %v1143_v29  ;;  %v1183_v57 = vmul.f32 %v1182_v47, %v2441_v59 }
 0x746   :  { %v2464_v37 = vadd.f32 1.0, %v1118_v32  ;;  %v1195_v54 = vadd.f32 0.112945676, %v1194_v44  ;;  %v1068_v63 = vadd.f32 1.1283791, %v1067_v49  ;;  %v1107_v13 = vmul.f32 %v1106_v1, %v2416_v35 }
 0x747   :  { %v1156_v41 = vmul.f32 %v1155_v31, %v2438_v56  ;;  %1874 = vrcp.f32 %v1079_v33  ;;  %v1145_v52 = vmul.f32 %v1144_v40, %v2438_v56  ;;  %v1184_v3 = vadd.f32 0.05243302, %v1183_v57 }
 0x748   :  { %1876 = vrcp.f32 %v2464_v37  ;;  %v1196_v60 = vmul.f32 %v1195_v54, %v2441_v59  ;;  %v1089_v5 = vand.u32 2147483647, %v1079_v33  ;;  %v1091_v6 = vand.u32 2147483648, %v1079_v33 }
 0x749   :  { %v1157_v45 = vadd.f32 0.4994258, %v1156_v41  ;;  %v1146_v0 = vadd.f32 0.18741608, %v1145_v52  ;;  %v1069_v11 = vmul.f32 %v1068_v63, %v2405_v27  ;;  %vm1085_vm10 = vweird.f32 %v1079_v33 }
 0x74a   :  { %v1197_v4 = vadd.f32 0.4994258, %v1196_v60  ;;  %v1185_v17 = vmul.f32 %v1184_v3, %v2441_v59  ;;  %vm1090_vm12 = vcmp.eq.f32.partialorder %v1089_v5, 8.507059e+37  ;;  %v1092_v42 = vor.u32 1.1754944e-38, %v1091_v6 }
 0x74b   :  { %v1158_v48 = vmul.f32 %v1157_v45, %v2438_v56  ;;  %v1147_v12 = vmul.f32 %v1146_v0, %v2438_v56  ;;  %v1129_v21 = vand.u32 2147483647, %v2464_v37  ;;  %v1131_v24 = vand.u32 2147483648, %v2464_v37 }
 0x74c   :  { %v1198_v10 = vmul.f32 %v1197_v4, %v2441_v59  ;;  %vm1125_vm14 = vweird.f32 %v2464_v37  ;;  %v1186_v29 = vadd.f32 0.18741608, %v1185_v17  ;;  %v1108_v19 = vadd.f32 1.1283791, %v1107_v13 }
 0x74d   :  { %v1159_v55 = vadd.f32 1.0, %v1158_v48  ;;  %v1875_v58 = vpop.eup %1874  ;;  %v1148_v56 = vadd.f32 1.1283791, %v1147_v12  ;;  %vm1130_vm2 = vcmp.eq.f32.partialorder %v1129_v21, 8.507059e+37  ;;  %v1132_v51 = vor.u32 1.1754944e-38, %v1131_v24 }
 0x74e   :  { %v1877_v61 = vpop.eup %1876  ;;  %v1081_v62 = vmul.f32 %v1875_v58, %v1079_v33  ;;  %vm1086_vm9 = vweird.f32 %v1875_v58  ;;  %v1199_v18 = vadd.f32 1.0, %v1198_v10  ;;  %v1187_v44 = vmul.f32 %v1186_v29, %v2441_v59 }
 0x74f   :  { %1878 = vrcp.f32 %v1159_v55  ;;  %v1121_v2 = vmul.f32 %v1877_v61, %v2464_v37  ;;  %vm1087_vm11 = vmor %vm1085_vm10, %vm1086_vm9  ;;  %vm1126_vm13 = vweird.f32 %v1877_v61  ;;  %v1169_v25 = vand.u32 2147483647, %v1159_v55 }
 0x750   :  { %v1082_v34 = vsub.f32 1.0, %v1081_v62  ;;  %1880 = vrcp.f32 %v1199_v18  ;;  %v1171_v26 = vand.u32 2147483648, %v1159_v55  ;;  %vm2483_vm0 = vmor %vm1125_vm14, %vm1126_vm13  ;;  %vm1165_vm1 = vweird.f32 %v1159_v55 }
 0x751   :  { %v1122_v50 = vsub.f32 1.0, %v1121_v2  ;;  %v1149_v40 = vmul.f32 %v1148_v56, %v2427_v43  ;;  %vm1170_vm4 = vcmp.eq.f32.partialorder %v1169_v25, 8.507059e+37  ;;  %v1109_v53 = vmul.f32 %v1108_v19, %v2408_v28 }
 0x752   :  { %v1083_v9 = vmul.f32 %v1875_v58, %v1082_v34  ;;  %v1172_v37 = vor.u32 1.1754944e-38, %v1171_v26  ;;  %v1209_v60 = vand.u32 2147483647, %v1199_v18  ;;  %v1049_v0 = vmul.f32 0.5, %v2396_v8 }
 0x753   :  { %v1123_v14 = vmul.f32 %v1877_v61, %v1122_v50  ;;  %v1051_v59 = vmul.f32 0.5, %v2418_v36  ;;  %vm1205_vm6 = vweird.f32 %v1199_v18  ;;  %v1050_v36 = vmul.f32 0.5, %v2398_v22 }
 0x754   :  { %v1084_v16 = vadd.f32 %v1875_v58, %v1083_v9  ;;  %vm1210_vm8 = vcmp.eq.f32.partialorder %v1209_v60, 8.507059e+37  ;;  %v1052_v12 = vmul.f32 0.5, %v2422_v38  ;;  %v1883_v38 = vld [vmem:[#allocation2 + $0x8] sm:$0xff] }
 0x755   :  { %v1879_v15 = vpop.eup %1878  ;;  %v1124_v23 = vadd.f32 %v1877_v61, %v1123_v14 }
 0x756   :  { %v1161_v20 = vmul.f32 %v1879_v15, %v1159_v55  ;;  %v1088_v7 = vsel %vm1087_vm11, %v1875_v58, %v1084_v16  ;;  %vm1166_vm15 = vweird.f32 %v1879_v15  ;;  %v1881_v39 = vpop.eup %1880  ;;  %v1188_v58 = vadd.f32 1.1283791, %v1187_v44 }
 0x757   :  { %v1093_v27 = vsel %vm1090_vm12, %v1092_v42, %v1088_v7  ;;  %v1128_v33 = vsel %vm2483_vm0, %v1877_v61, %v1124_v23  ;;  %vm1167_vm3 = vmor %vm1165_vm1, %vm1166_vm15  ;;  %v1201_v49 = vmul.f32 %v1881_v39, %v1199_v18  ;;  %v1211_v61 = vand.u32 2147483648, %v1199_v18  ;;  %v1851_v42 = vld [vmem:[%s2520_s14] ss:$0 sm:$0xff] }
 0x758   :  { %v1162_v35 = vsub.f32 1.0, %v1161_v20  ;;  %v1094_v30 = vmul.f32 %v1093_v27, %v1069_v11  ;;  %v1133_v48 = vsel %vm1130_vm2, %v1132_v51, %v1128_v33  ;;  %vm1206_vm5 = vweird.f32 %v1881_v39  ;;  %v1882_v20 = vld [vmem:[#allocation2] sm:$0xff] }
 0x759   :  { %v1202_v57 = vsub.f32 1.0, %v1201_v49  ;;  %v1134_v55 = vmul.f32 %v1133_v48, %v1109_v53  ;;  %v1189_v34 = vmul.f32 %v1188_v58, %v2430_v46  ;;  %vm1207_vm7 = vmor %vm1205_vm6, %vm1206_vm5  ;;  %v1212_v28 = vor.u32 1.1754944e-38, %v1211_v61 }
 0x75a   :  { %v1163_v31 = vmul.f32 %v1879_v15, %v1162_v35  ;;  %v1677_v45 = vclamps-f32 %v1094_v30, 1.0 }
 0x75b   :  { %v1203_v63 = vmul.f32 %v1881_v39, %v1202_v57  ;;  %v1678_v5 = vclamps-f32 %v1134_v55, 1.0 }
 0x75c   :  { %v1164_v41 = vadd.f32 %v1879_v15, %v1163_v31  ;;  %v1217_v43 = vadd.f32 1.0, %v1677_v45 }
 0x75d   :  { %v1204_v2 = vadd.f32 %v1881_v39, %v1203_v63  ;;  %v1218_v8 = vadd.f32 1.0, %v1678_v5 }
 0x75e   :  { %v1168_v47 = vsel %vm1167_vm3, %v1879_v15, %v1164_v41  ;;  %v1221_v3 = vmul.f32 %v1217_v43, %v1049_v0 }
 0x75f   :  { %v1173_v52 = vsel %vm1170_vm4, %v1172_v37, %v1168_v47  ;;  %v1208_v6 = vsel %vm1207_vm7, %v1881_v39, %v1204_v2  ;;  %v1222_v14 = vmul.f32 %v1218_v8, %v1050_v36 }
 0x760   :  { %v1174_v54 = vmul.f32 %v1173_v52, %v1149_v40  ;;  %v1213_v50 = vsel %vm1210_vm8, %v1212_v28, %v1208_v6 }
 0x761   :  { %v1214_v10 = vmul.f32 %v1213_v50, %v1189_v34 }
 0x762   :  { %v1679_v62 = vclamps-f32 %v1174_v54, 1.0 }
 0x763   :  { %v1680_v11 = vclamps-f32 %v1214_v10, 1.0 }
 0x764   :  { %v1219_v1 = vadd.f32 1.0, %v1679_v62 }
 0x765   :  { %v1220_v13 = vadd.f32 1.0, %v1680_v11 }
 0x766   :  { %v1223_v4 = vmul.f32 %v1219_v1, %v1051_v59 }
 0x767   :  { %v1224_v46 = vmul.f32 %v1220_v13, %v1052_v12 }
 0x768   :  { %v1225_v9 = vpack.c.bf16 %v1223_v4, %v1221_v3 }
 0x769   :  { %v1226_v15 = vpack.c.bf16 %v1224_v46, %v1222_v14 }
 0x76a   :  { %1363 = vmatmul.bf16.vlgmr.msra.gmra.mxu2 %v1225_v9 }
 0x76b   :  { %1377 = vmatmul.bf16.vlgmr.msrb.gmra.mxu3 %v1226_v15 }
 0x7ed   :  { %v1364_v16 = vpop.f32.mrf.mxu2 }
 0x7ee   :  { %v1378_v17 = vpop.f32.mrf.mxu3 }
 0x7ef   :  { %v1379_v18 = vadd.f32 %v1378_v17, %v1364_v16 }
 0x7f1   :  { %v1383_v21 = vadd.f32 %v1882_v20, %v1379_v18 }
 0x7f3   :  { %v1389_v7 = vadd.f32 %v1851_v42, %v1383_v21 }
 0x7f5   :  { %v1366_v23 = vpop.f32.mrf.mxu2  ;;  %1391 = vst [vmem:[#allocation19] sm:$0xff] %v1389_v7 }
 0x7f6   :  { %v1380_v22 = vpop.f32.mrf.mxu3 }
 0x7f7   :  { %v1381_v27 = vadd.f32 %v1380_v22, %v1366_v23 }
 0x7f9   :  { %v1384_v56 = vadd.f32 %v1883_v38, %v1381_v27 }
 0x7fb   :  { %v1390_v35 = vadd.f32 %v1851_v42, %v1384_v56 }
 0x7fd   :  { %1392 = vst [vmem:[#allocation19 + $0x8] sm:$0xff] %v1390_v35 }
 0x7fe   :  { %1405 = dma.vmem_to_hbm [thread:$0]  %s1398_s28, 256, %s1400_s29, [#allocation4], %s2163_s26, %s2163_s26, %s2164_s27  }
 0x7ff   :  { %2160 = dma.done.wait [#allocation4], 256  }
 0x800   :  { %2161 = vsyncadd [#allocation4], 4294967040 }
 0x801   :  { %1410 = vsyncpa [#allocation3], 1 }
 0x802   :  { %1411 = vsyncpa [#allocation6], 1 }
 0x803   :  { %1412 = vsyncpa [#allocation9], 1 }
 0x804   :  { %1413 = vsyncpa [#allocation12], 1 }
 0x805   :  { %1414 = vsyncpa [#allocation15], 1 }
 0x806   :  { %1415 = vsyncpa [#allocation18], 1 }
 0x807   :  { %1416 = vsyncpa [#allocation4], 1 }

</bundles_post_ra>
